<compile_context>
chip_gen: v6e
topology: v6e:2x2x1
jax: 0.10.0
libtpu: 0.0.40
codegen_flags: <defaults>
</compile_context>

<pallas_src>
import jax
import jax.numpy as jnp
from jax.experimental import pallas as pl
from jax.experimental.pallas import tpu as pltpu

LANE = 128  # TPU lane width; the tag dim is padded to this for a lane-dense output store.


def lstm_tagger_kernel(sent_ref, proj_ref, whh_ref, wtag_ref, btag_ref, out_ref):
    """Fused token-gather -> LSTM recurrence -> hidden2tag -> log_softmax.

    sent_ref : SMEM int32 [T]            token ids
    proj_ref : VMEM f32  [vocab, 4H]     emb @ W_ih^T + (b_ih + b_hh)   (per-token gate pre-acts)
    whh_ref  : VMEM f32  [H, 4H]         W_hh^T, compact gate layout i|f|g|o
    wtag_ref : VMEM f32  [H, TAGP]       W_tag^T, zero-padded tag columns
    btag_ref : VMEM f32  [1, TAGP]       b_tag, padded columns = -1e30 (softmax mask)
    out_ref  : VMEM f32  [T, TAGP]       log-probs (first tagset columns valid)
    """
    T = out_ref.shape[0]
    H = whh_ref.shape[0]
    vocab = proj_ref.shape[0]
    Gp = proj_ref.shape[1]          # = 4*H (128 for H=32)

    # --- 1) Gather per-token gate pre-activations.  Indices come from SMEM and do not
    #        depend on h/c, so these loads sit off the serial dependency chain.
    gx = []
    for t in range(T):
        idx = jnp.clip(sent_ref[t], 0, vocab - 1)        # clamp: VMEM has no bounds check
        gx.append(proj_ref[pl.ds(idx, 1), :])            # [1, 4H]

    whh = whh_ref[...]                                   # [H, 4H], 4 vregs, stays resident

    # Per-lane activation constants (hoisted out of the loop):
    #   sigmoid lanes (i,f,o): sigmoid(x) = 0.5 * tanh(0.5*x) + 0.5
    #   tanh lanes    (g)    : tanh(x)    = 1.0 * tanh(1.0*x) + 0.0
    lane = jax.lax.broadcasted_iota(jnp.int32, (1, Gp), 1)
    is_g = (lane >= 2 * H) & (lane < 3 * H)
    pre_scale = jnp.where(is_g, jnp.float32(1.0), jnp.float32(0.5))
    post_scale = jnp.where(is_g, jnp.float32(1.0), jnp.float32(0.5))
    post_shift = jnp.where(is_g, jnp.float32(0.0), jnp.float32(0.5))

    # --- 2) Recurrence.  h / c live in vregs; loop fully unrolled (T is small and static).
    h = jnp.zeros((1, H), jnp.float32)
    c = jnp.zeros((1, H), jnp.float32)
    hs = []
    for t in range(T):
        gates = gx[t] + jnp.dot(h, whh,
                                preferred_element_type=jnp.float32,
                                precision=jax.lax.Precision.HIGHEST)      # [1, 4H]
        tg = jnp.tanh(gates * pre_scale)          # ONE EUP push for all four gates
        act = post_scale * tg + post_shift        # sigmoid(i,f,o) / tanh(g) per lane
        i_g = act[:, 0 * H:1 * H]
        f_g = act[:, 1 * H:2 * H]
        g_g = act[:, 2 * H:3 * H]
        o_g = act[:, 3 * H:4 * H]
        c = f_g * c + i_g * g_g
        h = o_g * jnp.tanh(c)                     # second (and last) EUP push of the step
        hs.append(h)

    # --- 3) hidden2tag + log_softmax over the lane-dense padded tag dimension.
    hs_all = jnp.concatenate(hs, axis=0)                                   # [T, H], in vregs
    tag = jnp.dot(hs_all, wtag_ref[...],
                  preferred_element_type=jnp.float32,
                  precision=jax.lax.Precision.HIGHEST) + btag_ref[...]     # [T, TAGP]
    m = jnp.max(tag, axis=1, keepdims=True)
    z = tag - m
    lse = jnp.log(jnp.sum(jnp.exp(z), axis=1, keepdims=True))
    out_ref[...] = z - lse


def lstm_tagger_forward(sentence, emb_table, w_ih, w_hh, b_ih, b_hh, w_tag, b_tag):
    """sentence: int32 [T]; emb_table: [vocab, E]; w_ih: [4H, E]; w_hh: [4H, H];
    b_ih, b_hh: [4H]; w_tag: [tagset, H]; b_tag: [tagset]. Returns [T, tagset] log-probs."""
    T = sentence.shape[0]
    H = w_hh.shape[1]
    tagset = w_tag.shape[0]
    TAGP = max(LANE, pl.cdiv(tagset, LANE) * LANE)       # padded (lane-dense) tag dim

    # Compact gate layout (PyTorch gate order i|f|g|o kept contiguous on the lane axis).
    wih_t = w_ih.T.astype(jnp.float32)                   # [E, 4H]
    whh_t = w_hh.T.astype(jnp.float32)                   # [H, 4H]
    bias = (b_ih + b_hh).astype(jnp.float32)[None, :]    # [1, 4H]

    # Fold embedding lookup + input projection into a tiny per-token table (vocab x 4H);
    # the kernel just gathers rows of it.  This is a weight transform, not per-step work.
    proj = emb_table.astype(jnp.float32) @ wih_t + bias  # [vocab, 4H]

    # W_tag^T padded to lane-dense tag dim; padded bias columns = -1e30 masks log_softmax.
    wtag_t = jnp.pad(w_tag.T.astype(jnp.float32), ((0, 0), (0, TAGP - tagset)))
    btag = jnp.pad(b_tag.astype(jnp.float32)[None, :], ((0, 0), (0, TAGP - tagset)),
                   constant_values=-1e30)

    vmem = pl.BlockSpec(memory_space=pltpu.MemorySpace.VMEM)
    smem = pl.BlockSpec(memory_space=pltpu.MemorySpace.SMEM)

    out_padded = pl.pallas_call(
        lstm_tagger_kernel,
        out_shape=jax.ShapeDtypeStruct((T, TAGP), jnp.float32),
        in_specs=[smem, vmem, vmem, vmem, vmem],
        out_specs=vmem,
    )(sentence.astype(jnp.int32), proj, whh_t, wtag_t, btag)

    return out_padded[:, :tagset]


def _reference_forward(sentence, emb_table, w_ih, w_hh, b_ih, b_hh, w_tag, b_tag):
    """Pure-JAX reference mirroring torch semantics (sanity check)."""
    embeds = jnp.take(emb_table, sentence, axis=0)
    H = w_hh.shape[1]
    h = jnp.zeros((H,), jnp.float32)
    c = jnp.zeros((H,), jnp.float32)
    hs = []
    for t in range(sentence.shape[0]):
        g = w_ih @ embeds[t] + b_ih + w_hh @ h + b_hh
        i = jax.nn.sigmoid(g[0:H])
        f = jax.nn.sigmoid(g[H:2 * H])
        gg = jnp.tanh(g[2 * H:3 * H])
        o = jax.nn.sigmoid(g[3 * H:4 * H])
        c = f * c + i * gg
        h = o * jnp.tanh(c)
        hs.append(h)
    hs = jnp.stack(hs)
    tag_space = hs @ w_tag.T + b_tag
    return jax.nn.log_softmax(tag_space, axis=1)


if __name__ == "__main__":
    # Small shapes implied by the module: seq=8, embedding_dim=32, hidden=32,
    # vocab=16, tagset=8.
    T, E, H, VOCAB, TAGSET = 8, 32, 32, 16, 8

    key = jax.random.PRNGKey(0)
    ks = jax.random.split(key, 8)
    scale = 1.0 / jnp.sqrt(H)
    emb_table = jax.random.normal(ks[0], (VOCAB, E), jnp.float32)
    w_ih = jax.random.uniform(ks[1], (4 * H, E), jnp.float32, -scale, scale)
    w_hh = jax.random.uniform(ks[2], (4 * H, H), jnp.float32, -scale, scale)
    b_ih = jax.random.uniform(ks[3], (4 * H,), jnp.float32, -scale, scale)
    b_hh = jax.random.uniform(ks[4], (4 * H,), jnp.float32, -scale, scale)
    w_tag = jax.random.uniform(ks[5], (TAGSET, H), jnp.float32, -scale, scale)
    b_tag = jax.random.uniform(ks[6], (TAGSET,), jnp.float32, -scale, scale)
    sentence = jax.random.randint(ks[7], (T,), 0, VOCAB, jnp.int32)

    out = lstm_tagger_forward(sentence, emb_table, w_ih, w_hh, b_ih, b_hh, w_tag, b_tag)
    out = jax.block_until_ready(out)

    ref = _reference_forward(sentence, emb_table, w_ih, w_hh, b_ih, b_hh, w_tag, b_tag)
    assert out.shape == (T, TAGSET)
    assert jnp.max(jnp.abs(out - ref)) < 1e-4, "mismatch vs pure-JAX reference"

    print("KERNEL_OK")
</pallas_src>

<mosaic_0001>
module attributes {stable_mosaic.version = 11 : i64} {
  func.func @lstm_tagger_kernel(%arg0: memref<8xi32, #tpu.memory_space<smem>>, %arg1: memref<16x128xf32, #tpu.memory_space<vmem>>, %arg2: memref<32x128xf32, #tpu.memory_space<vmem>>, %arg3: memref<32x128xf32, #tpu.memory_space<vmem>>, %arg4: memref<1x128xf32, #tpu.memory_space<vmem>>, %arg5: memref<8x128xf32, #tpu.memory_space<vmem>>) attributes {dimension_semantics = [], scalar_prefetch = 0 : i64, scratch_operands = 0 : i64, tpu.core_type = #tpu.core_type<tc>} {
    %c0 = arith.constant 0 : index
    %0 = memref.load %arg0[%c0] : memref<8xi32, #tpu.memory_space<smem>>
    %c0_i32 = arith.constant 0 : i32
    %c15_i32 = arith.constant 15 : i32
    %1 = arith.maxsi %c0_i32, %0 : i32
    %2 = arith.minsi %c15_i32, %1 : i32
    %3 = arith.index_cast %2 : i32 to index
    %c0_0 = arith.constant 0 : index
    %4 = vector.load %arg1[%3, %c0_0] : memref<16x128xf32, #tpu.memory_space<vmem>>, vector<1x128xf32>
    %c1 = arith.constant 1 : index
    %5 = memref.load %arg0[%c1] : memref<8xi32, #tpu.memory_space<smem>>
    %c0_i32_1 = arith.constant 0 : i32
    %c15_i32_2 = arith.constant 15 : i32
    %6 = arith.maxsi %c0_i32_1, %5 : i32
    %7 = arith.minsi %c15_i32_2, %6 : i32
    %8 = arith.index_cast %7 : i32 to index
    %c0_3 = arith.constant 0 : index
    %9 = vector.load %arg1[%8, %c0_3] : memref<16x128xf32, #tpu.memory_space<vmem>>, vector<1x128xf32>
    %c2 = arith.constant 2 : index
    %10 = memref.load %arg0[%c2] : memref<8xi32, #tpu.memory_space<smem>>
    %c0_i32_4 = arith.constant 0 : i32
    %c15_i32_5 = arith.constant 15 : i32
    %11 = arith.maxsi %c0_i32_4, %10 : i32
    %12 = arith.minsi %c15_i32_5, %11 : i32
    %13 = arith.index_cast %12 : i32 to index
    %c0_6 = arith.constant 0 : index
    %14 = vector.load %arg1[%13, %c0_6] : memref<16x128xf32, #tpu.memory_space<vmem>>, vector<1x128xf32>
    %c3 = arith.constant 3 : index
    %15 = memref.load %arg0[%c3] : memref<8xi32, #tpu.memory_space<smem>>
    %c0_i32_7 = arith.constant 0 : i32
    %c15_i32_8 = arith.constant 15 : i32
    %16 = arith.maxsi %c0_i32_7, %15 : i32
    %17 = arith.minsi %c15_i32_8, %16 : i32
    %18 = arith.index_cast %17 : i32 to index
    %c0_9 = arith.constant 0 : index
    %19 = vector.load %arg1[%18, %c0_9] : memref<16x128xf32, #tpu.memory_space<vmem>>, vector<1x128xf32>
    %c4 = arith.constant 4 : index
    %20 = memref.load %arg0[%c4] : memref<8xi32, #tpu.memory_space<smem>>
    %c0_i32_10 = arith.constant 0 : i32
    %c15_i32_11 = arith.constant 15 : i32
    %21 = arith.maxsi %c0_i32_10, %20 : i32
    %22 = arith.minsi %c15_i32_11, %21 : i32
    %23 = arith.index_cast %22 : i32 to index
    %c0_12 = arith.constant 0 : index
    %24 = vector.load %arg1[%23, %c0_12] : memref<16x128xf32, #tpu.memory_space<vmem>>, vector<1x128xf32>
    %c5 = arith.constant 5 : index
    %25 = memref.load %arg0[%c5] : memref<8xi32, #tpu.memory_space<smem>>
    %c0_i32_13 = arith.constant 0 : i32
    %c15_i32_14 = arith.constant 15 : i32
    %26 = arith.maxsi %c0_i32_13, %25 : i32
    %27 = arith.minsi %c15_i32_14, %26 : i32
    %28 = arith.index_cast %27 : i32 to index
    %c0_15 = arith.constant 0 : index
    %29 = vector.load %arg1[%28, %c0_15] : memref<16x128xf32, #tpu.memory_space<vmem>>, vector<1x128xf32>
    %c6 = arith.constant 6 : index
    %30 = memref.load %arg0[%c6] : memref<8xi32, #tpu.memory_space<smem>>
    %c0_i32_16 = arith.constant 0 : i32
    %c15_i32_17 = arith.constant 15 : i32
    %31 = arith.maxsi %c0_i32_16, %30 : i32
    %32 = arith.minsi %c15_i32_17, %31 : i32
    %33 = arith.index_cast %32 : i32 to index
    %c0_18 = arith.constant 0 : index
    %34 = vector.load %arg1[%33, %c0_18] : memref<16x128xf32, #tpu.memory_space<vmem>>, vector<1x128xf32>
    %c7 = arith.constant 7 : index
    %35 = memref.load %arg0[%c7] : memref<8xi32, #tpu.memory_space<smem>>
    %c0_i32_19 = arith.constant 0 : i32
    %c15_i32_20 = arith.constant 15 : i32
    %36 = arith.maxsi %c0_i32_19, %35 : i32
    %37 = arith.minsi %c15_i32_20, %36 : i32
    %38 = arith.index_cast %37 : i32 to index
    %c0_21 = arith.constant 0 : index
    %39 = vector.load %arg1[%38, %c0_21] : memref<16x128xf32, #tpu.memory_space<vmem>>, vector<1x128xf32>
    %c0_22 = arith.constant 0 : index
    %c0_23 = arith.constant 0 : index
    %40 = vector.load %arg2[%c0_22, %c0_23] : memref<32x128xf32, #tpu.memory_space<vmem>>, vector<32x128xf32>
    %41 = tpu.iota {dimensions = array<i32: 1>} : vector<1x128xi32>
    %c64_i32 = arith.constant 64 : i32
    %42 = vector.broadcast %c64_i32 : i32 to vector<1x128xi32>
    %43 = arith.cmpi sge, %41, %42 : vector<1x128xi32>
    %c96_i32 = arith.constant 96 : i32
    %44 = vector.broadcast %c96_i32 : i32 to vector<1x128xi32>
    %45 = arith.cmpi slt, %41, %44 : vector<1x128xi32>
    %46 = arith.andi %43, %45 : vector<1x128xi1>
    %cst = arith.constant 1.000000e+00 : f32
    %cst_24 = arith.constant 5.000000e-01 : f32
    %47 = vector.broadcast %cst : f32 to vector<1x128xf32>
    %48 = vector.broadcast %cst_24 : f32 to vector<1x128xf32>
    %49 = arith.select %46, %47, %48 : vector<1x128xi1>, vector<1x128xf32>
    %cst_25 = arith.constant 1.000000e+00 : f32
    %cst_26 = arith.constant 5.000000e-01 : f32
    %50 = vector.broadcast %cst_25 : f32 to vector<1x128xf32>
    %51 = vector.broadcast %cst_26 : f32 to vector<1x128xf32>
    %52 = arith.select %46, %50, %51 : vector<1x128xi1>, vector<1x128xf32>
    %cst_27 = arith.constant 0.000000e+00 : f32
    %cst_28 = arith.constant 5.000000e-01 : f32
    %53 = vector.broadcast %cst_27 : f32 to vector<1x128xf32>
    %54 = vector.broadcast %cst_28 : f32 to vector<1x128xf32>
    %55 = arith.select %46, %53, %54 : vector<1x128xi1>, vector<1x128xf32>
    %cst_29 = arith.constant 0.000000e+00 : f32
    %56 = vector.broadcast %cst_29 : f32 to vector<1x32xf32>
    %cst_30 = arith.constant 0.000000e+00 : f32
    %57 = vector.broadcast %cst_30 : f32 to vector<1x32xf32>
    %cst_31 = arith.constant dense<0.000000e+00> : vector<1x128xf32>
    %58 = tpu.matmul %56, %40, %cst_31 {dimension_numbers = #tpu.dot_dimension_numbers<[1], [0], [0], [1], [0, 0, 1, 1], [], []>, precision = #tpu.contract_precision<fp32>} : vector<1x32xf32>, vector<32x128xf32>, vector<1x128xf32> -> vector<1x128xf32>
    %59 = arith.addf %4, %58 : vector<1x128xf32>
    %60 = arith.mulf %59, %49 : vector<1x128xf32>
    %61 = math.tanh %60 : vector<1x128xf32>
    %62 = arith.mulf %52, %61 : vector<1x128xf32>
    %63 = arith.addf %62, %55 : vector<1x128xf32>
    %64 = vector.extract_strided_slice %63 {offsets = [0, 0], sizes = [1, 32], strides = [1, 1]} : vector<1x128xf32> to vector<1x32xf32>
    %65 = vector.extract_strided_slice %63 {offsets = [0, 32], sizes = [1, 32], strides = [1, 1]} : vector<1x128xf32> to vector<1x32xf32>
    %66 = vector.extract_strided_slice %63 {offsets = [0, 64], sizes = [1, 32], strides = [1, 1]} : vector<1x128xf32> to vector<1x32xf32>
    %67 = vector.extract_strided_slice %63 {offsets = [0, 96], sizes = [1, 32], strides = [1, 1]} : vector<1x128xf32> to vector<1x32xf32>
    %68 = arith.mulf %65, %57 : vector<1x32xf32>
    %69 = arith.mulf %64, %66 : vector<1x32xf32>
    %70 = arith.addf %68, %69 : vector<1x32xf32>
    %71 = math.tanh %70 : vector<1x32xf32>
    %72 = arith.mulf %67, %71 : vector<1x32xf32>
    %cst_32 = arith.constant dense<0.000000e+00> : vector<1x128xf32>
    %73 = tpu.matmul %72, %40, %cst_32 {dimension_numbers = #tpu.dot_dimension_numbers<[1], [0], [0], [1], [0, 0, 1, 1], [], []>, precision = #tpu.contract_precision<fp32>} : vector<1x32xf32>, vector<32x128xf32>, vector<1x128xf32> -> vector<1x128xf32>
    %74 = arith.addf %9, %73 : vector<1x128xf32>
    %75 = arith.mulf %74, %49 : vector<1x128xf32>
    %76 = math.tanh %75 : vector<1x128xf32>
    %77 = arith.mulf %52, %76 : vector<1x128xf32>
    %78 = arith.addf %77, %55 : vector<1x128xf32>
    %79 = vector.extract_strided_slice %78 {offsets = [0, 0], sizes = [1, 32], strides = [1, 1]} : vector<1x128xf32> to vector<1x32xf32>
    %80 = vector.extract_strided_slice %78 {offsets = [0, 32], sizes = [1, 32], strides = [1, 1]} : vector<1x128xf32> to vector<1x32xf32>
    %81 = vector.extract_strided_slice %78 {offsets = [0, 64], sizes = [1, 32], strides = [1, 1]} : vector<1x128xf32> to vector<1x32xf32>
    %82 = vector.extract_strided_slice %78 {offsets = [0, 96], sizes = [1, 32], strides = [1, 1]} : vector<1x128xf32> to vector<1x32xf32>
    %83 = arith.mulf %80, %70 : vector<1x32xf32>
    %84 = arith.mulf %79, %81 : vector<1x32xf32>
    %85 = arith.addf %83, %84 : vector<1x32xf32>
    %86 = math.tanh %85 : vector<1x32xf32>
    %87 = arith.mulf %82, %86 : vector<1x32xf32>
    %cst_33 = arith.constant dense<0.000000e+00> : vector<1x128xf32>
    %88 = tpu.matmul %87, %40, %cst_33 {dimension_numbers = #tpu.dot_dimension_numbers<[1], [0], [0], [1], [0, 0, 1, 1], [], []>, precision = #tpu.contract_precision<fp32>} : vector<1x32xf32>, vector<32x128xf32>, vector<1x128xf32> -> vector<1x128xf32>
    %89 = arith.addf %14, %88 : vector<1x128xf32>
    %90 = arith.mulf %89, %49 : vector<1x128xf32>
    %91 = math.tanh %90 : vector<1x128xf32>
    %92 = arith.mulf %52, %91 : vector<1x128xf32>
    %93 = arith.addf %92, %55 : vector<1x128xf32>
    %94 = vector.extract_strided_slice %93 {offsets = [0, 0], sizes = [1, 32], strides = [1, 1]} : vector<1x128xf32> to vector<1x32xf32>
    %95 = vector.extract_strided_slice %93 {offsets = [0, 32], sizes = [1, 32], strides = [1, 1]} : vector<1x128xf32> to vector<1x32xf32>
    %96 = vector.extract_strided_slice %93 {offsets = [0, 64], sizes = [1, 32], strides = [1, 1]} : vector<1x128xf32> to vector<1x32xf32>
    %97 = vector.extract_strided_slice %93 {offsets = [0, 96], sizes = [1, 32], strides = [1, 1]} : vector<1x128xf32> to vector<1x32xf32>
    %98 = arith.mulf %95, %85 : vector<1x32xf32>
    %99 = arith.mulf %94, %96 : vector<1x32xf32>
    %100 = arith.addf %98, %99 : vector<1x32xf32>
    %101 = math.tanh %100 : vector<1x32xf32>
    %102 = arith.mulf %97, %101 : vector<1x32xf32>
    %cst_34 = arith.constant dense<0.000000e+00> : vector<1x128xf32>
    %103 = tpu.matmul %102, %40, %cst_34 {dimension_numbers = #tpu.dot_dimension_numbers<[1], [0], [0], [1], [0, 0, 1, 1], [], []>, precision = #tpu.contract_precision<fp32>} : vector<1x32xf32>, vector<32x128xf32>, vector<1x128xf32> -> vector<1x128xf32>
    %104 = arith.addf %19, %103 : vector<1x128xf32>
    %105 = arith.mulf %104, %49 : vector<1x128xf32>
    %106 = math.tanh %105 : vector<1x128xf32>
    %107 = arith.mulf %52, %106 : vector<1x128xf32>
    %108 = arith.addf %107, %55 : vector<1x128xf32>
    %109 = vector.extract_strided_slice %108 {offsets = [0, 0], sizes = [1, 32], strides = [1, 1]} : vector<1x128xf32> to vector<1x32xf32>
    %110 = vector.extract_strided_slice %108 {offsets = [0, 32], sizes = [1, 32], strides = [1, 1]} : vector<1x128xf32> to vector<1x32xf32>
    %111 = vector.extract_strided_slice %108 {offsets = [0, 64], sizes = [1, 32], strides = [1, 1]} : vector<1x128xf32> to vector<1x32xf32>
    %112 = vector.extract_strided_slice %108 {offsets = [0, 96], sizes = [1, 32], strides = [1, 1]} : vector<1x128xf32> to vector<1x32xf32>
    %113 = arith.mulf %110, %100 : vector<1x32xf32>
    %114 = arith.mulf %109, %111 : vector<1x32xf32>
    %115 = arith.addf %113, %114 : vector<1x32xf32>
    %116 = math.tanh %115 : vector<1x32xf32>
    %117 = arith.mulf %112, %116 : vector<1x32xf32>
    %cst_35 = arith.constant dense<0.000000e+00> : vector<1x128xf32>
    %118 = tpu.matmul %117, %40, %cst_35 {dimension_numbers = #tpu.dot_dimension_numbers<[1], [0], [0], [1], [0, 0, 1, 1], [], []>, precision = #tpu.contract_precision<fp32>} : vector<1x32xf32>, vector<32x128xf32>, vector<1x128xf32> -> vector<1x128xf32>
    %119 = arith.addf %24, %118 : vector<1x128xf32>
    %120 = arith.mulf %119, %49 : vector<1x128xf32>
    %121 = math.tanh %120 : vector<1x128xf32>
    %122 = arith.mulf %52, %121 : vector<1x128xf32>
    %123 = arith.addf %122, %55 : vector<1x128xf32>
    %124 = vector.extract_strided_slice %123 {offsets = [0, 0], sizes = [1, 32], strides = [1, 1]} : vector<1x128xf32> to vector<1x32xf32>
    %125 = vector.extract_strided_slice %123 {offsets = [0, 32], sizes = [1, 32], strides = [1, 1]} : vector<1x128xf32> to vector<1x32xf32>
    %126 = vector.extract_strided_slice %123 {offsets = [0, 64], sizes = [1, 32], strides = [1, 1]} : vector<1x128xf32> to vector<1x32xf32>
    %127 = vector.extract_strided_slice %123 {offsets = [0, 96], sizes = [1, 32], strides = [1, 1]} : vector<1x128xf32> to vector<1x32xf32>
    %128 = arith.mulf %125, %115 : vector<1x32xf32>
    %129 = arith.mulf %124, %126 : vector<1x32xf32>
    %130 = arith.addf %128, %129 : vector<1x32xf32>
    %131 = math.tanh %130 : vector<1x32xf32>
    %132 = arith.mulf %127, %131 : vector<1x32xf32>
    %cst_36 = arith.constant dense<0.000000e+00> : vector<1x128xf32>
    %133 = tpu.matmul %132, %40, %cst_36 {dimension_numbers = #tpu.dot_dimension_numbers<[1], [0], [0], [1], [0, 0, 1, 1], [], []>, precision = #tpu.contract_precision<fp32>} : vector<1x32xf32>, vector<32x128xf32>, vector<1x128xf32> -> vector<1x128xf32>
    %134 = arith.addf %29, %133 : vector<1x128xf32>
    %135 = arith.mulf %134, %49 : vector<1x128xf32>
    %136 = math.tanh %135 : vector<1x128xf32>
    %137 = arith.mulf %52, %136 : vector<1x128xf32>
    %138 = arith.addf %137, %55 : vector<1x128xf32>
    %139 = vector.extract_strided_slice %138 {offsets = [0, 0], sizes = [1, 32], strides = [1, 1]} : vector<1x128xf32> to vector<1x32xf32>
    %140 = vector.extract_strided_slice %138 {offsets = [0, 32], sizes = [1, 32], strides = [1, 1]} : vector<1x128xf32> to vector<1x32xf32>
    %141 = vector.extract_strided_slice %138 {offsets = [0, 64], sizes = [1, 32], strides = [1, 1]} : vector<1x128xf32> to vector<1x32xf32>
    %142 = vector.extract_strided_slice %138 {offsets = [0, 96], sizes = [1, 32], strides = [1, 1]} : vector<1x128xf32> to vector<1x32xf32>
    %143 = arith.mulf %140, %130 : vector<1x32xf32>
    %144 = arith.mulf %139, %141 : vector<1x32xf32>
    %145 = arith.addf %143, %144 : vector<1x32xf32>
    %146 = math.tanh %145 : vector<1x32xf32>
    %147 = arith.mulf %142, %146 : vector<1x32xf32>
    %cst_37 = arith.constant dense<0.000000e+00> : vector<1x128xf32>
    %148 = tpu.matmul %147, %40, %cst_37 {dimension_numbers = #tpu.dot_dimension_numbers<[1], [0], [0], [1], [0, 0, 1, 1], [], []>, precision = #tpu.contract_precision<fp32>} : vector<1x32xf32>, vector<32x128xf32>, vector<1x128xf32> -> vector<1x128xf32>
    %149 = arith.addf %34, %148 : vector<1x128xf32>
    %150 = arith.mulf %149, %49 : vector<1x128xf32>
    %151 = math.tanh %150 : vector<1x128xf32>
    %152 = arith.mulf %52, %151 : vector<1x128xf32>
    %153 = arith.addf %152, %55 : vector<1x128xf32>
    %154 = vector.extract_strided_slice %153 {offsets = [0, 0], sizes = [1, 32], strides = [1, 1]} : vector<1x128xf32> to vector<1x32xf32>
    %155 = vector.extract_strided_slice %153 {offsets = [0, 32], sizes = [1, 32], strides = [1, 1]} : vector<1x128xf32> to vector<1x32xf32>
    %156 = vector.extract_strided_slice %153 {offsets = [0, 64], sizes = [1, 32], strides = [1, 1]} : vector<1x128xf32> to vector<1x32xf32>
    %157 = vector.extract_strided_slice %153 {offsets = [0, 96], sizes = [1, 32], strides = [1, 1]} : vector<1x128xf32> to vector<1x32xf32>
    %158 = arith.mulf %155, %145 : vector<1x32xf32>
    %159 = arith.mulf %154, %156 : vector<1x32xf32>
    %160 = arith.addf %158, %159 : vector<1x32xf32>
    %161 = math.tanh %160 : vector<1x32xf32>
    %162 = arith.mulf %157, %161 : vector<1x32xf32>
    %cst_38 = arith.constant dense<0.000000e+00> : vector<1x128xf32>
    %163 = tpu.matmul %162, %40, %cst_38 {dimension_numbers = #tpu.dot_dimension_numbers<[1], [0], [0], [1], [0, 0, 1, 1], [], []>, precision = #tpu.contract_precision<fp32>} : vector<1x32xf32>, vector<32x128xf32>, vector<1x128xf32> -> vector<1x128xf32>
    %164 = arith.addf %39, %163 : vector<1x128xf32>
    %165 = arith.mulf %164, %49 : vector<1x128xf32>
    %166 = math.tanh %165 : vector<1x128xf32>
    %167 = arith.mulf %52, %166 : vector<1x128xf32>
    %168 = arith.addf %167, %55 : vector<1x128xf32>
    %169 = vector.extract_strided_slice %168 {offsets = [0, 0], sizes = [1, 32], strides = [1, 1]} : vector<1x128xf32> to vector<1x32xf32>
    %170 = vector.extract_strided_slice %168 {offsets = [0, 32], sizes = [1, 32], strides = [1, 1]} : vector<1x128xf32> to vector<1x32xf32>
    %171 = vector.extract_strided_slice %168 {offsets = [0, 64], sizes = [1, 32], strides = [1, 1]} : vector<1x128xf32> to vector<1x32xf32>
    %172 = vector.extract_strided_slice %168 {offsets = [0, 96], sizes = [1, 32], strides = [1, 1]} : vector<1x128xf32> to vector<1x32xf32>
    %173 = arith.mulf %170, %160 : vector<1x32xf32>
    %174 = arith.mulf %169, %171 : vector<1x32xf32>
    %175 = arith.addf %173, %174 : vector<1x32xf32>
    %176 = math.tanh %175 : vector<1x32xf32>
    %177 = arith.mulf %172, %176 : vector<1x32xf32>
    %178 = tpu.concatenate %72, %87, %102, %117, %132, %147, %162, %177 in 0 : vector<1x32xf32>, vector<1x32xf32>, vector<1x32xf32>, vector<1x32xf32>, vector<1x32xf32>, vector<1x32xf32>, vector<1x32xf32>, vector<1x32xf32> -> vector<8x32xf32>
    %c0_39 = arith.constant 0 : index
    %c0_40 = arith.constant 0 : index
    %179 = vector.load %arg3[%c0_39, %c0_40] : memref<32x128xf32, #tpu.memory_space<vmem>>, vector<32x128xf32>
    %cst_41 = arith.constant dense<0.000000e+00> : vector<8x128xf32>
    %180 = tpu.matmul %178, %179, %cst_41 {dimension_numbers = #tpu.dot_dimension_numbers<[1], [0], [0], [1], [0, 0, 1, 1], [], []>, precision = #tpu.contract_precision<fp32>} : vector<8x32xf32>, vector<32x128xf32>, vector<8x128xf32> -> vector<8x128xf32>
    %c0_42 = arith.constant 0 : index
    %c0_43 = arith.constant 0 : index
    %181 = vector.load %arg4[%c0_42, %c0_43] : memref<1x128xf32, #tpu.memory_space<vmem>>, vector<1x128xf32>
    %182 = vector.broadcast %181 : vector<1x128xf32> to vector<8x128xf32>
    %183 = arith.addf %180, %182 : vector<8x128xf32>
    %cst_44 = arith.constant dense<0xFF800000> : vector<8xf32>
    %184 = vector.multi_reduction <maximumf>, %183, %cst_44 [1] : vector<8x128xf32> to vector<8xf32>
    %185 = vector.shape_cast %184 : vector<8xf32> to vector<8x1xf32>
    %186 = vector.broadcast %185 : vector<8x1xf32> to vector<8x128xf32>
    %187 = arith.subf %183, %186 : vector<8x128xf32>
    %188 = math.exp %187 : vector<8x128xf32>
    %cst_45 = arith.constant dense<0.000000e+00> : vector<8xf32>
    %189 = vector.multi_reduction <add>, %188, %cst_45 [1] : vector<8x128xf32> to vector<8xf32>
    %190 = vector.shape_cast %189 : vector<8xf32> to vector<8x1xf32>
    %191 = math.log %190 : vector<8x1xf32>
    %192 = vector.broadcast %191 : vector<8x1xf32> to vector<8x128xf32>
    %193 = arith.subf %187, %192 : vector<8x128xf32>
    %c0_46 = arith.constant 0 : index
    %c0_47 = arith.constant 0 : index
    %194 = vector.load %arg5[%c0_46, %c0_47] : memref<8x128xf32, #tpu.memory_space<vmem>>, vector<8x128xf32>
    tpu.vector_store %arg5[%c0_46, %c0_47], %193 {strides = array<i32>} : memref<8x128xf32, #tpu.memory_space<vmem>>, vector<8x128xf32>,
    return
  }
}

</mosaic_0001>

<bundles_post_ra>
// kernel: tpu_custom_call.1
= control target key start
LH: loop header
LB: loop body
LE: loop exit
PB: predicated region body
PF: predicated region fallthrough
CT: control target
= control target key end

     0   :  { %10 = vsyncpa [#allocation5], 0  ;;  %s6667_s0 = inlined_call_operand.hbm [shape: s32[8], index: 0, kind: input, shape index: {}]   ;;  %s6668_s1 = inlined_call_operand.hbm [shape: f32[16,128], index: 1, kind: input, shape index: {}]   ;;  %s6669_s2 = inlined_call_operand.hbm [shape: f32[32,128], index: 2, kind: input, shape index: {}]   ;;  %s6670_s3 = inlined_call_operand.hbm [shape: f32[32,128], index: 3, kind: input, shape index: {}]   ;;  %s6671_s4 = inlined_call_operand.vmem [shape: f32[1,128], index: 4, kind: input, shape index: {}]   ;;  %s6672_s5 = inlined_call_operand.hbm [shape: f32[8,128], index: 5, kind: output, shape index: {}]  }
   0x1   :  { %11 = vsyncpa [#allocation3], 0 }
   0x2   :  { %12 = vsyncpa [#allocation8], 0 }
   0x3   :  { %13 = vsyncpa [#allocation4], 0  ;;  %s5873_s18 = smov [#allocation7]   ;;  %s5874_s20 = smov [#allocation6]  }
   0x4   :  { %s39_s19 = sshll.u32 %s5873_s18, 4  ;;  %s27_s21 = sshll.u32 %s5874_s20, 4  ;;  %s40_s19 = int_to_ptr.vmem [resolvable:$true] %s39_s19  ;;  %s28_s21 = int_to_ptr.vmem [resolvable:$true] %s27_s21 }
   0x5   :  { %s5785_s22 = scalar_lea.vmem %s40_s19, 512  ;;  %p5790_p1 = scmp.lt.s32.totalorder %s40_s19, %s40_s19 }
   0x6   :  { %p5786_p0 = scmp.ne.s32.totalorder %s40_s19, %s5785_s22  ;;  %p5791_p2 = scmp.lt.s32.totalorder %s5785_s22, %s5785_s22 }
   0x8   :  { %p5792_p3 = por %p5791_p2, %p5790_p1 }
   0xa   :  { %p5793_p4 = pnand %p5792_p3, %p5786_p0 }
   0xc   :  { %5796 = shalt.err (!%p5793_p4)
}
   0xd   :  { %s5875_s23 = smov 128   ;;  %s5876_s24 = smov 8  }
   0xe   :  { %45 = dma.hbm_to_vmem [thread:$0]  %s6669_s2, 512, %s40_s19, [#allocation8], %s5875_s23, %s5875_s23, %s5876_s24  }
   0xf   :  { %s5877_s27 = smov [#allocation2]   ;;  %s5813_s30 = scalar_lea.vmem %s28_s21, 256 }
  0x10   :  { %21 = dma.hbm_to_smem %s6667_s0, 16, %s5877_s27, [#allocation5]  }
  0x11   :  { %p5814_p5 = scmp.ne.s32.totalorder %s28_s21, %s5813_s30  ;;  %p5818_p6 = scmp.lt.s32.totalorder %s28_s21, %s28_s21 }
  0x12   :  { %p5819_p7 = scmp.lt.s32.totalorder %s5813_s30, %s5813_s30 }
  0x14   :  { %p5820_p8 = por %p5819_p7, %p5818_p6 }
  0x16   :  { %p5821_p9 = pnand %p5820_p8, %p5814_p5 }
  0x18   :  { %5824 = shalt.err (!%p5821_p9)
}
  0x19   :  { %33 = dma.hbm_to_vmem [thread:$0]  %s6668_s1, 256, %s28_s21, [#allocation3], %s5875_s23, %s5875_s23, %s5876_s24  }
  0x1a   :  { %s5878_s8 = smov [#allocation9]  }
  0x1b   :  { %s51_s9 = sshll.u32 %s5878_s8, 4  ;;  %s52_s9 = int_to_ptr.vmem [resolvable:$true] %s51_s9 }
  0x1c   :  { %s5833_s2 = scalar_lea.vmem %s52_s9, 512  ;;  %p5838_p11 = scmp.lt.s32.totalorder %s52_s9, %s52_s9 }
  0x1d   :  { %p5834_p10 = scmp.ne.s32.totalorder %s52_s9, %s5833_s2  ;;  %p5839_p12 = scmp.lt.s32.totalorder %s5833_s2, %s5833_s2 }
  0x1f   :  { %p5840_p13 = por %p5839_p12, %p5838_p11 }
  0x21   :  { %p5841_p0 = pnand %p5840_p13, %p5834_p10 }
  0x23   :  { %5844 = shalt.err (!%p5841_p0)
}
  0x24   :  { %57 = dma.hbm_to_vmem [thread:$0]  %s6670_s3, 512, %s52_s9, [#allocation8], %s5875_s23, %s5875_s23, %s5876_s24  }
  0x25   :  { %5865 = dma.done.wait [#allocation5], 16  }
  0x26   :  { %5866 = vsyncadd [#allocation5], 4294967280 }
  0x27   :  { %5867 = dma.done.wait [#allocation3], 256  }
  0x28   :  { %5868 = vsyncadd [#allocation3], 4294967040 }
  0x29   :  { %5869 = dma.done.wait [#allocation8], 1024  }
  0x2a   :  { %5870 = vsyncadd [#allocation8], 4294966272 }
  0x2b   :  { %72 = sfence }
  0x2c   :  { %v132_v0 = vld [vmem:[#allocation7 + $0x18] sm:$0xff]  ;;  %v131_v1 = vld [vmem:[#allocation7 + $0x10] sm:$0xff]  ;;  %v130_v2 = vld [vmem:[#allocation7 + $0x8] sm:$0xff]  ;;  %v5879_v3 = vmov 0.0   ;;  %vm5880_vm0 = vmmov 0   ;;  %s73_s1 = sld [smem:[#allocation2]]  ;;  %v133_v31 = vlaneseq }
  0x2d   :  { %5135 = vmatprep.subr.mxu0 %v5879_v3  ;;  %v5928_v4 = vand.u32 4294901760, %v132_v0  ;;  %v5930_v5 = vand.u32 4294901760, %v131_v1  ;;  %v5932_v6 = vand.u32 4294901760, %v130_v2  ;;  %5146 = vmatprep.subr.mxu1 %v5879_v3  ;;  %v129_v7 = vld [vmem:[#allocation7] sm:$0xff]  ;;  %v5881_v44 = vmov 0.5   ;;  %s5882_s11 = smov 64  }
  0x2e   :  { %v5935_v8 = vand.u32 4294901760, %v129_v7  ;;  %5143 = vmatprep.mubr.msk.f32.mxu0 %vm5880_vm0, %v5879_v3  ;;  %5154 = vmatprep.mubr.msk.f32.mxu1 %vm5880_vm0, %v5879_v3  ;;  %v134_v34 = vand.u32 127, %v133_v31  ;;  %s5883_s12 = smov 32   ;;  %vm140_vm4 = vcmask 261120   ;;  %s4806_s13 = sld [smem:[#allocation2 + $0x1]]  ;;  %vm4250_vm5 = vcmask 1040384  }
  0x2f   :  { %5136 = vmatpush3.msra.mxu0 %v5928_v4  ;;  %v5943_v9 = vsub.f32 %v132_v0, %v5928_v4  ;;  %v5946_v10 = vsub.f32 %v131_v1, %v5930_v5  ;;  %v5949_v11 = vsub.f32 %v130_v2, %v5932_v6  ;;  %s4812_s15 = sld [smem:[#allocation2 + $0x2]]  ;;  %vm4252_vm6 = vcmask 1041408  }
  0x30   :  { %5137 = vmatprep.subr.mxu0 %v5879_v3  ;;  %v5953_v12 = vsub.f32 %v129_v7, %v5935_v8  ;;  %vm135_vm1 = vcmp.ge.s32.totalorder %v134_v34, 64  ;;  %vm136_vm2 = vcmp.lt.s32.totalorder %v134_v34, 96  ;;  %s4818_s17 = sld [smem:[#allocation2 + $0x3]]  ;;  %vm4254_vm7 = vcmask 1042432  }
  0x31   :  { %5138 = vmatpush3.msra.mxu0 %v5930_v5  ;;  %v5957_v13 = vand.u32 4294901760, %v5943_v9  ;;  %v5960_v14 = vand.u32 4294901760, %v5946_v10  ;;  %v5963_v15 = vand.u32 4294901760, %v5949_v11  ;;  %vm137_vm3 = vmand %vm135_vm1, %vm136_vm2  ;;  %s4824_s19 = sld [smem:[#allocation2 + $0x4]]  ;;  %vm4256_vm8 = vcmask 1043456  }
  0x32   :  { %5139 = vmatprep.subr.mxu0 %v5879_v3  ;;  %v5967_v16 = vand.u32 4294901760, %v5953_v12  ;;  %p74_p1 = scmp.gt.s32.totalorder %s73_s1, 0  ;;  %p4801_p2 = scmp.lt.s32.totalorder %s73_s1, 15  ;;  %v6063_v45 = vsel %vm137_vm3, 1.0, %v5881_v44  ;;  %v6066_v50 = vsel %vm137_vm3, 0.0, %v5881_v44  ;;  %vm4258_vm9 = vcmask 1044480  }
  0x33   :  { %5140 = vmatpush3.msra.mxu0 %v5932_v6  ;;  %v251_v17 = vsub.f32 %v5943_v9, %v5957_v13  ;;  %v258_v18 = vsub.f32 %v5946_v10, %v5960_v14  ;;  %v265_v19 = vsub.f32 %v5949_v11, %v5963_v15  ;;  %s4830_s21 = sld [smem:[#allocation2 + $0x5]]  ;;  %vm4260_vm10 = vcmask 1045504  }
  0x34   :  { %5141 = vmatprep.subr.mxu0 %v5879_v3  ;;  %v272_v22 = vsub.f32 %v5953_v12, %v5967_v16  ;;  %s6674_s1 = smov (!%p74_p1, %s73_s1), 0  ;;  %p81_p3 = scmp.gt.s32.totalorder %s4806_s13, 0  ;;  %vm4262_vm11 = vcmask 1046528  }
  0x35   :  { %5142 = vmatpush3.msra.mxu0 %v5935_v8  ;;  %v5978_v20 = vand.u32 4294901760, %v251_v17  ;;  %v5980_v21 = vand.u32 4294901760, %v258_v18  ;;  %v5988_v23 = vand.u32 4294901760, %v265_v19  ;;  %s6676_s1 = smov (!%p4801_p2, %s6674_s1), 15  ;;  %p4807_p4 = scmp.lt.s32.totalorder %s4806_s13, 15 }
  0x36   :  { %5157 = vmatprep.subr.mxu0 %v5879_v3  ;;  %5144 = vmatmul.mubr.f32.vlgmr.msra.gmra.mxu0 %v5879_v3  ;;  %v5994_v24 = vand.u32 4294901760, %v272_v22  ;;  %s78_s3 = scalar_lea.vmem [#allocation6], %s6676_s1  ;;  %s6678_s13 = smov (!%p81_p3, %s4806_s13), 0 }
  0x37   :  { %5147 = vmatpush3.msra.mxu1 %v5978_v20  ;;  %5158 = vmatpush3.msra.mxu0 %v5943_v9  ;;  %v79_v41 = vld [vmem:[%s78_s3] sm:$0x1]  ;;  %s6680_s13 = smov (!%p4807_p4, %s6678_s13), 15  ;;  %p88_p5 = scmp.gt.s32.totalorder %s4812_s15, 0 }
  0x38   :  { %5148 = vmatprep.subr.mxu1 %v5879_v3  ;;  %5159 = vmatprep.subr.mxu0 %v5879_v3  ;;  %s85_s14 = scalar_lea.vmem [#allocation6], %s6680_s13  ;;  %p4813_p6 = scmp.lt.s32.totalorder %s4812_s15, 15 }
  0x39   :  { %5149 = vmatpush3.msra.mxu1 %v5980_v21  ;;  %5160 = vmatpush3.msra.mxu0 %v5946_v10  ;;  %s6682_s15 = smov (!%p88_p5, %s4812_s15), 0  ;;  %p95_p7 = scmp.gt.s32.totalorder %s4818_s17, 0 }
  0x3a   :  { %5150 = vmatprep.subr.mxu1 %v5879_v3  ;;  %5161 = vmatprep.subr.mxu0 %v5879_v3  ;;  %s6684_s15 = smov (!%p4813_p6, %s6682_s15), 15  ;;  %p4819_p8 = scmp.lt.s32.totalorder %s4818_s17, 15 }
  0x3b   :  { %5151 = vmatpush3.msra.mxu1 %v5988_v23  ;;  %5162 = vmatpush3.msra.mxu0 %v5949_v11  ;;  %s92_s16 = scalar_lea.vmem [#allocation6], %s6684_s15  ;;  %s6686_s17 = smov (!%p95_p7, %s4818_s17), 0 }
  0x3c   :  { %5152 = vmatprep.subr.mxu1 %v5879_v3  ;;  %5163 = vmatprep.subr.mxu0 %v5879_v3  ;;  %s6688_s17 = smov (!%p4819_p8, %s6686_s17), 15  ;;  %p102_p9 = scmp.gt.s32.totalorder %s4824_s19, 0 }
  0x3d   :  { %5153 = vmatpush3.msra.mxu1 %v5994_v24  ;;  %5164 = vmatpush3.msra.mxu0 %v5953_v12  ;;  %s99_s18 = scalar_lea.vmem [#allocation6], %s6688_s17  ;;  %p4825_p10 = scmp.lt.s32.totalorder %s4824_s19, 15 }
  0x3e   :  { %5155 = vmatmul.mubr.f32.vlgmr.msra.gmra.mxu1 %v5879_v3  ;;  %5168 = vmatprep.subr.mxu1 %v5879_v3  ;;  %s6690_s19 = smov (!%p102_p9, %s4824_s19), 0  ;;  %p109_p11 = scmp.gt.s32.totalorder %s4830_s21, 0 }
  0x3f   :  { %5165 = vmatprep.mubr.msk.f32.mxu0 %vm5880_vm0, %v5879_v3  ;;  %5169 = vmatpush3.msra.mxu1 %v5928_v4  ;;  %s6692_s19 = smov (!%p4825_p10, %s6690_s19), 15  ;;  %p4831_p12 = scmp.lt.s32.totalorder %s4830_s21, 15 }
  0x40   :  { %5166 = vmatmul.mubr.f32.vlgmr.msra.gmra.mxu0 %v5879_v3  ;;  %5170 = vmatprep.subr.mxu1 %v5879_v3  ;;  %s106_s20 = scalar_lea.vmem [#allocation6], %s6692_s19  ;;  %s6694_s21 = smov (!%p109_p11, %s4830_s21), 0 }
  0x41   :  { %5179 = vmatprep.subr.mxu0 %v5879_v3  ;;  %5171 = vmatpush3.msra.mxu1 %v5930_v5  ;;  %s6696_s21 = smov (!%p4831_p12, %s6694_s21), 15  ;;  %s4836_s23 = sld [smem:[#allocation2 + $0x6]] }
  0x42   :  { %5180 = vmatpush3.msra.mxu0 %v5957_v13  ;;  %5172 = vmatprep.subr.mxu1 %v5879_v3  ;;  %s113_s22 = scalar_lea.vmem [#allocation6], %s6696_s21  ;;  %s4842_s25 = sld [smem:[#allocation2 + $0x7]] }
  0x43   :  { %5181 = vmatprep.subr.mxu0 %v5879_v3  ;;  %5173 = vmatpush3.msra.mxu1 %v5932_v6 }
  0x44   :  { %5182 = vmatpush3.msra.mxu0 %v5960_v14  ;;  %5174 = vmatprep.subr.mxu1 %v5879_v3 }
  0x45   :  { %5183 = vmatprep.subr.mxu0 %v5879_v3  ;;  %5175 = vmatpush3.msra.mxu1 %v5935_v8 }
  0x46   :  { %5176 = vmatprep.mubr.msk.f32.mxu1 %vm5880_vm0, %v5879_v3  ;;  %5184 = vmatpush3.msra.mxu0 %v5963_v15 }
  0x47   :  { %5177 = vmatmul.mubr.f32.vlgmr.msra.gmra.mxu1 %v5879_v3  ;;  %5185 = vmatprep.subr.mxu0 %v5879_v3  ;;  %p116_p13 = scmp.gt.s32.totalorder %s4836_s23, 0  ;;  %p4837_p0 = scmp.lt.s32.totalorder %s4836_s23, 15 }
  0x48   :  { %5190 = vmatprep.subr.mxu1 %v5879_v3  ;;  %5186 = vmatpush3.msra.mxu0 %v5967_v16  ;;  %p123_p1 = scmp.gt.s32.totalorder %s4842_s25, 0  ;;  %p4843_p2 = scmp.lt.s32.totalorder %s4842_s25, 15 }
  0x49   :  { %5187 = vmatprep.mubr.msk.f32.mxu0 %vm5880_vm0, %v5879_v3  ;;  %5191 = vmatpush3.msra.mxu1 %v5928_v4  ;;  %s6698_s23 = smov (!%p116_p13, %s4836_s23), 0 }
  0x4a   :  { %5188 = vmatmul.mubr.f32.vlgmr.msra.gmra.mxu0 %v5879_v3  ;;  %5192 = vmatprep.subr.mxu1 %v5879_v3  ;;  %s6700_s23 = smov (!%p4837_p0, %s6698_s23), 15  ;;  %s6702_s25 = smov (!%p123_p1, %s4842_s25), 0 }
  0x4b   :  { %5193 = vmatpush3.msra.mxu1 %v5930_v5  ;;  %5198 = vmatprep.mubr.msk.f32.mxu1 %vm5880_vm0, %v5879_v3  ;;  %s120_s24 = scalar_lea.vmem [#allocation6], %s6700_s23  ;;  %s6704_s25 = smov (!%p4843_p2, %s6702_s25), 15 }
  0x4c   :  { %5194 = vmatprep.subr.mxu1 %v5879_v3  ;;  %5201 = vmatprep.subr.mxu0 %v5879_v3  ;;  %s127_s26 = scalar_lea.vmem [#allocation6], %s6704_s25 }
  0x4d   :  { %5195 = vmatpush3.msra.mxu1 %v5932_v6  ;;  %5202 = vmatpush3.msra.mxu0 %v5928_v4 }
  0x4e   :  { %5196 = vmatprep.subr.mxu1 %v5879_v3  ;;  %5203 = vmatprep.subr.mxu0 %v5879_v3 }
  0x4f   :  { %5197 = vmatpush3.msra.mxu1 %v5935_v8  ;;  %5204 = vmatpush3.msra.mxu0 %v5930_v5 }
  0x50   :  { %5199 = vmatmul.mubr.f32.vlgmr.msra.gmra.mxu1 %v5879_v3  ;;  %5212 = vmatprep.subr.mxu1 %v5879_v3 }
  0x51   :  { %5213 = vmatpush3.msra.mxu1 %v5978_v20  ;;  %5220 = vmatprep.mubr.msk.f32.mxu1 %vm5880_vm0, %v5879_v3 }
  0x52   :  { %5214 = vmatprep.subr.mxu1 %v5879_v3  ;;  %5205 = vmatprep.subr.mxu0 %v5879_v3 }
  0x53   :  { %5215 = vmatpush3.msra.mxu1 %v5980_v21  ;;  %5206 = vmatpush3.msra.mxu0 %v5932_v6 }
  0x54   :  { %5216 = vmatprep.subr.mxu1 %v5879_v3  ;;  %5207 = vmatprep.subr.mxu0 %v5879_v3 }
  0x55   :  { %5217 = vmatpush3.msra.mxu1 %v5988_v23  ;;  %5208 = vmatpush3.msra.mxu0 %v5935_v8 }
  0x56   :  { %5218 = vmatprep.subr.mxu1 %v5879_v3  ;;  %5209 = vmatprep.mubr.msk.f32.mxu0 %vm5880_vm0, %v5879_v3 }
  0x57   :  { %5219 = vmatpush3.msra.mxu1 %v5994_v24  ;;  %5223 = vmatprep.subr.mxu0 %v5879_v3 }
  0x58   :  { %5234 = vmatprep.subr.mxu1 %v5879_v3 }
  0xf6   :  { %v219_v25 = vpop.f32.mrf.mxu0 }
  0xf8   :  { %v5145_v26 = vpop.f32.mrf.mxu0 }
  0xfe   :  { %v310_v27 = vpop.f32.mrf.mxu1 }
  0xff   :  { %v311_v32 = vadd.f32 %v310_v27, %v219_v25 }
 0x100   :  { %v5156_v28 = vpop.f32.mrf.mxu1  ;;  %v390_v29 = vpop.f32.mrf.mxu0 }
 0x101   :  { %v391_v35 = vadd.f32 %v390_v29, %v311_v32 }
 0x102   :  { %v5167_v30 = vpop.f32.mrf.mxu0 }
 0x107   :  { %v467_v33 = vpop.f32.mrf.mxu1 }
 0x108   :  { %v468_v38 = vadd.f32 %v467_v33, %v391_v35 }
 0x109   :  { %v5178_v36 = vpop.f32.mrf.mxu1 }
 0x10a   :  { %v550_v37 = vpop.f32.mrf.mxu0  ;;  %v86_v36 = vld [vmem:[%s85_s14] sm:$0x1] }
 0x10b   :  { %v551_v40 = vadd.f32 %v550_v37, %v468_v38 }
 0x10c   :  { %v5189_v39 = vpop.f32.mrf.mxu0 }
 0x110   :  { %v625_v42 = vpop.f32.mrf.mxu1 }
 0x111   :  { %v626_v43 = vadd.f32 %v625_v42, %v551_v40 }
 0x112   :  { %v5200_v46 = vpop.f32.mrf.mxu1 }
 0x113   :  { %v629_v47 = vadd.f32 %v626_v43, %v79_v41 }
 0x115   :  { %v630_v48 = vmul.f32 %v629_v47, %v6063_v45 }
 0x117   :  { %5741 = vtanh.f32 %v630_v48 }
 0x124   :  { %v5742_v49 = vpop.eup %5741 }
 0x125   :  { %v632_v51 = vmul.f32 %v5742_v49, %v6063_v45 }
 0x127   :  { %v633_v52 = vadd.f32 %v632_v51, %v6066_v50 }
 0x129   :  { %636 = vrot.lane.b32.xlu0 %v633_v52, %s5882_s11  ;;  %v634_v55 = vmul.f32 0.0, %v633_v52 }
 0x19b   :  { %v637_v53 = vpop.permute.xlu0 %636 }
 0x19c   :  { %v639_v54 = vmul.f32 %v637_v53, %v633_v52 }
 0x19e   :  { %641 = vrot.lane.b32.xlu0 %v639_v54, %s5883_s12 }
 0x210   :  { %v642_v56 = vpop.permute.xlu0 %641 }
 0x211   :  { %v6072_v57 = vadd.f32 %v642_v56, %v634_v55 }
 0x213   :  { %5743 = vtanh.f32 %v6072_v57 }
 0x220   :  { %v5744_v58 = vpop.eup %5743 }
 0x221   :  { %647 = vrot.lane.b32.xlu1 %v5744_v58, %s5882_s11 }
 0x293   :  { %v648_v59 = vpop.permute.xlu1 %647 }
 0x294   :  { %v6076_v60 = vmul.f32 %v648_v59, %v633_v52 }
 0x296   :  { %652 = vrot.lane.b32.xlu1 %v6076_v60, %s5883_s12 }
 0x308   :  { %v653_v61 = vpop.permute.xlu1 %652 }
 0x309   :  { %v654_v62 = vsel %vm140_vm4, %v653_v61, 0 }
 0x30a   :  { %v725_v63 = vand.u32 4294901760, %v654_v62 }
 0x30c   :  { %v726_v0 = vsub.f32 %v654_v62, %v725_v63  ;;  %5221 = vmatmul.mubr.f32.vlgmr.msra.gmra.mxu1 %v725_v63 }
 0x30d   :  { %5235 = vmatpush3.msra.mxu1 %v5928_v4  ;;  %5242 = vmatprep.mubr.msk.f32.mxu1 %vm5880_vm0, %v5879_v3 }
 0x30e   :  { %v727_v1 = vand.u32 4294901760, %v726_v0  ;;  %5236 = vmatprep.subr.mxu1 %v5879_v3 }
 0x30f   :  { %5237 = vmatpush3.msra.mxu1 %v5930_v5 }
 0x310   :  { %v728_v2 = vsub.f32 %v726_v0, %v727_v1  ;;  %5238 = vmatprep.subr.mxu1 %v5879_v3 }
 0x311   :  { %5239 = vmatpush3.msra.mxu1 %v5932_v6 }
 0x312   :  { %v729_v7 = vand.u32 4294901760, %v728_v2  ;;  %5240 = vmatprep.subr.mxu1 %v5879_v3 }
 0x313   :  { %5241 = vmatpush3.msra.mxu1 %v5935_v8 }
 0x314   :  { %5243 = vmatmul.mubr.f32.vlgmr.msra.gmra.mxu1 %v727_v1  ;;  %5256 = vmatprep.subr.mxu1 %v5879_v3 }
 0x315   :  { %5210 = vmatmul.mubr.f32.vlgmr.msra.gmra.mxu0 %v729_v7  ;;  %5257 = vmatpush3.msra.mxu1 %v5928_v4 }
 0x316   :  { %5224 = vmatpush3.msra.mxu0 %v5943_v9  ;;  %5258 = vmatprep.subr.mxu1 %v5879_v3 }
 0x317   :  { %5225 = vmatprep.subr.mxu0 %v5879_v3  ;;  %5259 = vmatpush3.msra.mxu1 %v5930_v5 }
 0x318   :  { %5226 = vmatpush3.msra.mxu0 %v5946_v10  ;;  %5260 = vmatprep.subr.mxu1 %v5879_v3 }
 0x319   :  { %5227 = vmatprep.subr.mxu0 %v5879_v3  ;;  %5261 = vmatpush3.msra.mxu1 %v5932_v6 }
 0x31a   :  { %5228 = vmatpush3.msra.mxu0 %v5949_v11  ;;  %5262 = vmatprep.subr.mxu1 %v5879_v3 }
 0x31b   :  { %5229 = vmatprep.subr.mxu0 %v5879_v3  ;;  %5231 = vmatprep.mubr.msk.f32.mxu0 %vm5880_vm0, %v5879_v3 }
 0x31c   :  { %5230 = vmatpush3.msra.mxu0 %v5953_v12  ;;  %5263 = vmatpush3.msra.mxu1 %v5935_v8 }
 0x31d   :  { %5264 = vmatprep.mubr.msk.f32.mxu1 %vm5880_vm0, %v5879_v3  ;;  %5232 = vmatmul.mubr.f32.vlgmr.msra.gmra.mxu0 %v726_v0 }
 0x31e   :  { %5245 = vmatprep.subr.mxu0 %v5879_v3  ;;  %5265 = vmatmul.mubr.f32.vlgmr.msra.gmra.mxu1 %v725_v63 }
 0x31f   :  { %5246 = vmatpush3.msra.mxu0 %v5957_v13  ;;  %5253 = vmatprep.mubr.msk.f32.mxu0 %vm5880_vm0, %v5879_v3 }
 0x320   :  { %5247 = vmatprep.subr.mxu0 %v5879_v3  ;;  %5278 = vmatprep.subr.mxu1 %v5879_v3 }
 0x321   :  { %5248 = vmatpush3.msra.mxu0 %v5960_v14  ;;  %5279 = vmatpush3.msra.mxu1 %v5978_v20 }
 0x322   :  { %5249 = vmatprep.subr.mxu0 %v5879_v3  ;;  %5280 = vmatprep.subr.mxu1 %v5879_v3 }
 0x323   :  { %5250 = vmatpush3.msra.mxu0 %v5963_v15  ;;  %5281 = vmatpush3.msra.mxu1 %v5980_v21 }
 0x324   :  { %5251 = vmatprep.subr.mxu0 %v5879_v3  ;;  %5282 = vmatprep.subr.mxu1 %v5879_v3 }
 0x325   :  { %5252 = vmatpush3.msra.mxu0 %v5967_v16  ;;  %5283 = vmatpush3.msra.mxu1 %v5988_v23 }
 0x326   :  { %5254 = vmatmul.mubr.f32.vlgmr.msra.gmra.mxu0 %v725_v63  ;;  %5284 = vmatprep.subr.mxu1 %v5879_v3 }
 0x327   :  { %5285 = vmatpush3.msra.mxu1 %v5994_v24  ;;  %5267 = vmatprep.subr.mxu0 %v5879_v3 }
 0x328   :  { %5286 = vmatprep.mubr.msk.f32.mxu1 %vm5880_vm0, %v5879_v3  ;;  %5300 = vmatprep.subr.mxu1 %v5879_v3 }
 0x329   :  { %5268 = vmatpush3.msra.mxu0 %v5928_v4  ;;  %5275 = vmatprep.mubr.msk.f32.mxu0 %vm5880_vm0, %v5879_v3 }
 0x32a   :  { %5269 = vmatprep.subr.mxu0 %v5879_v3 }
 0x32b   :  { %5270 = vmatpush3.msra.mxu0 %v5930_v5 }
 0x32c   :  { %5271 = vmatprep.subr.mxu0 %v5879_v3 }
 0x32d   :  { %5272 = vmatpush3.msra.mxu0 %v5932_v6 }
 0x32e   :  { %5273 = vmatprep.subr.mxu0 %v5879_v3 }
 0x32f   :  { %5274 = vmatpush3.msra.mxu0 %v5935_v8 }
 0x330   :  { %5289 = vmatprep.subr.mxu0 %v5879_v3 }
 0x3cc   :  { %v822_v17 = vpop.f32.mrf.mxu1 }
 0x3ce   :  { %v5222_v18 = vpop.f32.mrf.mxu1 }
 0x3d4   :  { %v979_v19 = vpop.f32.mrf.mxu1 }
 0x3d5   :  { %v731_v22 = vpop.f32.mrf.mxu0 }
 0x3d6   :  { %v5244_v25 = vpop.f32.mrf.mxu1  ;;  %v823_v29 = vadd.f32 %v822_v17, %v731_v22 }
 0x3d7   :  { %v5211_v26 = vpop.f32.mrf.mxu0 }
 0x3dd   :  { %v902_v27 = vpop.f32.mrf.mxu0 }
 0x3de   :  { %v1137_v28 = vpop.f32.mrf.mxu1  ;;  %v903_v32 = vadd.f32 %v902_v27, %v823_v29 }
 0x3df   :  { %v5233_v30 = vpop.f32.mrf.mxu0 }
 0x3e0   :  { %v5266_v31 = vpop.f32.mrf.mxu1  ;;  %v980_v33 = vadd.f32 %v979_v19, %v903_v32  ;;  %v93_v30 = vld [vmem:[%s92_s16] sm:$0x1] }
 0x3e6   :  { %v1062_v34 = vpop.f32.mrf.mxu0 }
 0x3e7   :  { %v1063_v35 = vadd.f32 %v1062_v34, %v980_v33 }
 0x3e8   :  { %v5255_v37 = vpop.f32.mrf.mxu0 }
 0x3e9   :  { %v1138_v38 = vadd.f32 %v1137_v28, %v1063_v35 }
 0x3eb   :  { %v1141_v39 = vadd.f32 %v1138_v38, %v86_v36 }
 0x3ed   :  { %v1142_v40 = vmul.f32 %v1141_v39, %v6063_v45 }
 0x3ef   :  { %5745 = vtanh.f32 %v1142_v40 }
 0x3fc   :  { %v5746_v41 = vpop.eup %5745 }
 0x3fd   :  { %v1144_v42 = vmul.f32 %v5746_v41, %v6063_v45 }
 0x3ff   :  { %v1145_v43 = vadd.f32 %v1144_v42, %v6066_v50 }
 0x401   :  { %1148 = vrot.lane.b32.xlu0 %v1145_v43, %s5882_s11  ;;  %v1146_v47 = vmul.f32 %v1145_v43, %v6072_v57 }
 0x473   :  { %v1149_v44 = vpop.permute.xlu0 %1148 }
 0x474   :  { %v1151_v46 = vmul.f32 %v1149_v44, %v1145_v43 }
 0x476   :  { %1153 = vrot.lane.b32.xlu1 %v1151_v46, %s5883_s12 }
 0x4e8   :  { %v1154_v48 = vpop.permute.xlu1 %1153 }
 0x4e9   :  { %v6147_v49 = vadd.f32 %v1154_v48, %v1146_v47 }
 0x4eb   :  { %5747 = vtanh.f32 %v6147_v49 }
 0x4f8   :  { %v5748_v51 = vpop.eup %5747 }
 0x4f9   :  { %1159 = vrot.lane.b32.xlu0 %v5748_v51, %s5882_s11 }
 0x56b   :  { %v1160_v52 = vpop.permute.xlu0 %1159 }
 0x56c   :  { %v6151_v53 = vmul.f32 %v1160_v52, %v1145_v43 }
 0x56e   :  { %1164 = vrot.lane.b32.xlu1 %v6151_v53, %s5883_s12  ;;  %v4235_v44 = vrot.slane %v6151_v53, 7 }
 0x570   :  { %v4251_v51 = vsel %vm4250_vm5, %v6076_v60, %v4235_v44 }
 0x5e0   :  { %v1165_v54 = vpop.permute.xlu1 %1164 }
 0x5e1   :  { %v1166_v55 = vsel %vm140_vm4, %v1165_v54, 0 }
 0x5e2   :  { %v1237_v56 = vand.u32 4294901760, %v1166_v55 }
 0x5e4   :  { %v1238_v58 = vsub.f32 %v1166_v55, %v1237_v56  ;;  %5287 = vmatmul.mubr.f32.vlgmr.msra.gmra.mxu1 %v1237_v56 }
 0x5e5   :  { %5301 = vmatpush3.msra.mxu1 %v5928_v4  ;;  %5308 = vmatprep.mubr.msk.f32.mxu1 %vm5880_vm0, %v5879_v3 }
 0x5e6   :  { %v1239_v57 = vand.u32 4294901760, %v1238_v58  ;;  %5302 = vmatprep.subr.mxu1 %v5879_v3 }
 0x5e7   :  { %5303 = vmatpush3.msra.mxu1 %v5930_v5 }
 0x5e8   :  { %v1240_v59 = vsub.f32 %v1238_v58, %v1239_v57  ;;  %5304 = vmatprep.subr.mxu1 %v5879_v3 }
 0x5e9   :  { %5305 = vmatpush3.msra.mxu1 %v5932_v6 }
 0x5ea   :  { %v1241_v61 = vand.u32 4294901760, %v1240_v59  ;;  %5306 = vmatprep.subr.mxu1 %v5879_v3 }
 0x5eb   :  { %5307 = vmatpush3.msra.mxu1 %v5935_v8 }
 0x5ec   :  { %5309 = vmatmul.mubr.f32.vlgmr.msra.gmra.mxu1 %v1239_v57  ;;  %5322 = vmatprep.subr.mxu1 %v5879_v3 }
 0x5ed   :  { %5276 = vmatmul.mubr.f32.vlgmr.msra.gmra.mxu0 %v1241_v61  ;;  %5323 = vmatpush3.msra.mxu1 %v5928_v4 }
 0x5ee   :  { %5290 = vmatpush3.msra.mxu0 %v5943_v9  ;;  %5324 = vmatprep.subr.mxu1 %v5879_v3 }
 0x5ef   :  { %5291 = vmatprep.subr.mxu0 %v5879_v3  ;;  %5325 = vmatpush3.msra.mxu1 %v5930_v5 }
 0x5f0   :  { %5292 = vmatpush3.msra.mxu0 %v5946_v10  ;;  %5326 = vmatprep.subr.mxu1 %v5879_v3 }
 0x5f1   :  { %5293 = vmatprep.subr.mxu0 %v5879_v3  ;;  %5327 = vmatpush3.msra.mxu1 %v5932_v6 }
 0x5f2   :  { %5294 = vmatpush3.msra.mxu0 %v5949_v11  ;;  %5328 = vmatprep.subr.mxu1 %v5879_v3 }
 0x5f3   :  { %5295 = vmatprep.subr.mxu0 %v5879_v3  ;;  %5297 = vmatprep.mubr.msk.f32.mxu0 %vm5880_vm0, %v5879_v3 }
 0x5f4   :  { %5296 = vmatpush3.msra.mxu0 %v5953_v12  ;;  %5329 = vmatpush3.msra.mxu1 %v5935_v8 }
 0x5f5   :  { %5330 = vmatprep.mubr.msk.f32.mxu1 %vm5880_vm0, %v5879_v3  ;;  %5298 = vmatmul.mubr.f32.vlgmr.msra.gmra.mxu0 %v1238_v58 }
 0x5f6   :  { %5311 = vmatprep.subr.mxu0 %v5879_v3  ;;  %5331 = vmatmul.mubr.f32.vlgmr.msra.gmra.mxu1 %v1237_v56 }
 0x5f7   :  { %5312 = vmatpush3.msra.mxu0 %v5957_v13  ;;  %5319 = vmatprep.mubr.msk.f32.mxu0 %vm5880_vm0, %v5879_v3 }
 0x5f8   :  { %5313 = vmatprep.subr.mxu0 %v5879_v3  ;;  %5344 = vmatprep.subr.mxu1 %v5879_v3 }
 0x5f9   :  { %5314 = vmatpush3.msra.mxu0 %v5960_v14  ;;  %5345 = vmatpush3.msra.mxu1 %v5978_v20 }
 0x5fa   :  { %5315 = vmatprep.subr.mxu0 %v5879_v3  ;;  %5346 = vmatprep.subr.mxu1 %v5879_v3 }
 0x5fb   :  { %5316 = vmatpush3.msra.mxu0 %v5963_v15  ;;  %5347 = vmatpush3.msra.mxu1 %v5980_v21 }
 0x5fc   :  { %5317 = vmatprep.subr.mxu0 %v5879_v3  ;;  %5348 = vmatprep.subr.mxu1 %v5879_v3 }
 0x5fd   :  { %5318 = vmatpush3.msra.mxu0 %v5967_v16  ;;  %5349 = vmatpush3.msra.mxu1 %v5988_v23 }
 0x5fe   :  { %5320 = vmatmul.mubr.f32.vlgmr.msra.gmra.mxu0 %v1237_v56  ;;  %5350 = vmatprep.subr.mxu1 %v5879_v3 }
 0x5ff   :  { %5351 = vmatpush3.msra.mxu1 %v5994_v24  ;;  %5333 = vmatprep.subr.mxu0 %v5879_v3 }
 0x600   :  { %5352 = vmatprep.mubr.msk.f32.mxu1 %vm5880_vm0, %v5879_v3  ;;  %5366 = vmatprep.subr.mxu1 %v5879_v3 }
 0x601   :  { %5334 = vmatpush3.msra.mxu0 %v5928_v4  ;;  %5341 = vmatprep.mubr.msk.f32.mxu0 %vm5880_vm0, %v5879_v3 }
 0x602   :  { %5335 = vmatprep.subr.mxu0 %v5879_v3 }
 0x603   :  { %5336 = vmatpush3.msra.mxu0 %v5930_v5 }
 0x604   :  { %5337 = vmatprep.subr.mxu0 %v5879_v3 }
 0x605   :  { %5338 = vmatpush3.msra.mxu0 %v5932_v6 }
 0x606   :  { %5339 = vmatprep.subr.mxu0 %v5879_v3 }
 0x607   :  { %5340 = vmatpush3.msra.mxu0 %v5935_v8 }
 0x608   :  { %5355 = vmatprep.subr.mxu0 %v5879_v3 }
 0x6a4   :  { %v1334_v62 = vpop.f32.mrf.mxu1 }
 0x6a6   :  { %v5288_v63 = vpop.f32.mrf.mxu1 }
 0x6ac   :  { %v1491_v0 = vpop.f32.mrf.mxu1 }
 0x6ad   :  { %v1243_v1 = vpop.f32.mrf.mxu0 }
 0x6ae   :  { %v5310_v2 = vpop.f32.mrf.mxu1  ;;  %v1335_v19 = vadd.f32 %v1334_v62, %v1243_v1 }
 0x6af   :  { %v5277_v7 = vpop.f32.mrf.mxu0 }
 0x6b5   :  { %v1414_v17 = vpop.f32.mrf.mxu0 }
 0x6b6   :  { %v1649_v18 = vpop.f32.mrf.mxu1  ;;  %v1415_v26 = vadd.f32 %v1414_v17, %v1335_v19 }
 0x6b7   :  { %v5299_v22 = vpop.f32.mrf.mxu0 }
 0x6b8   :  { %v5332_v25 = vpop.f32.mrf.mxu1  ;;  %v1492_v27 = vadd.f32 %v1491_v0, %v1415_v26 }
 0x6be   :  { %v1574_v28 = vpop.f32.mrf.mxu0 }
 0x6bf   :  { %v1575_v29 = vadd.f32 %v1574_v28, %v1492_v27  ;;  %v100_v27 = vld [vmem:[%s99_s18] sm:$0x1] }
 0x6c0   :  { %v5321_v31 = vpop.f32.mrf.mxu0 }
 0x6c1   :  { %v1650_v32 = vadd.f32 %v1649_v18, %v1575_v29 }
 0x6c3   :  { %v1653_v33 = vadd.f32 %v1650_v32, %v93_v30 }
 0x6c5   :  { %v1654_v34 = vmul.f32 %v1653_v33, %v6063_v45 }
 0x6c7   :  { %5749 = vtanh.f32 %v1654_v34 }
 0x6d4   :  { %v5750_v35 = vpop.eup %5749 }
 0x6d5   :  { %v1656_v36 = vmul.f32 %v5750_v35, %v6063_v45 }
 0x6d7   :  { %v1657_v37 = vadd.f32 %v1656_v36, %v6066_v50 }
 0x6d9   :  { %1660 = vrot.lane.b32.xlu0 %v1657_v37, %s5882_s11  ;;  %v1658_v40 = vmul.f32 %v1657_v37, %v6147_v49 }
 0x74b   :  { %v1661_v38 = vpop.permute.xlu0 %1660 }
 0x74c   :  { %v1663_v39 = vmul.f32 %v1661_v38, %v1657_v37 }
 0x74e   :  { %1665 = vrot.lane.b32.xlu1 %v1663_v39, %s5883_s12 }
 0x7c0   :  { %v1666_v41 = vpop.permute.xlu1 %1665 }
 0x7c1   :  { %v6222_v42 = vadd.f32 %v1666_v41, %v1658_v40 }
 0x7c3   :  { %5751 = vtanh.f32 %v6222_v42 }
 0x7d0   :  { %v5752_v43 = vpop.eup %5751 }
 0x7d1   :  { %1671 = vrot.lane.b32.xlu0 %v5752_v43, %s5882_s11 }
 0x843   :  { %v1672_v46 = vpop.permute.xlu0 %1671 }
 0x844   :  { %v1674_v47 = vmul.f32 %v1672_v46, %v1657_v37 }
 0x846   :  { %v4237_v48 = vrot.slane %v1674_v47, 6  ;;  %1676 = vrot.lane.b32.xlu1 %v1674_v47, %s5883_s12 }
 0x848   :  { %v6229_v49 = vsel %vm4252_vm6, %v4251_v51, %v4237_v48 }
 0x8b8   :  { %v1677_v52 = vpop.permute.xlu1 %1676 }
 0x8b9   :  { %v1678_v54 = vsel %vm140_vm4, %v1677_v52, 0 }
 0x8ba   :  { %v1749_v55 = vand.u32 4294901760, %v1678_v54 }
 0x8bc   :  { %v1750_v56 = vsub.f32 %v1678_v54, %v1749_v55  ;;  %5353 = vmatmul.mubr.f32.vlgmr.msra.gmra.mxu1 %v1749_v55 }
 0x8bd   :  { %5367 = vmatpush3.msra.mxu1 %v5928_v4  ;;  %5374 = vmatprep.mubr.msk.f32.mxu1 %vm5880_vm0, %v5879_v3 }
 0x8be   :  { %v1751_v53 = vand.u32 4294901760, %v1750_v56  ;;  %5368 = vmatprep.subr.mxu1 %v5879_v3 }
 0x8bf   :  { %5369 = vmatpush3.msra.mxu1 %v5930_v5 }
 0x8c0   :  { %v1752_v58 = vsub.f32 %v1750_v56, %v1751_v53  ;;  %5370 = vmatprep.subr.mxu1 %v5879_v3 }
 0x8c1   :  { %5371 = vmatpush3.msra.mxu1 %v5932_v6 }
 0x8c2   :  { %v1753_v60 = vand.u32 4294901760, %v1752_v58  ;;  %5372 = vmatprep.subr.mxu1 %v5879_v3 }
 0x8c3   :  { %5373 = vmatpush3.msra.mxu1 %v5935_v8 }
 0x8c4   :  { %5375 = vmatmul.mubr.f32.vlgmr.msra.gmra.mxu1 %v1751_v53  ;;  %5388 = vmatprep.subr.mxu1 %v5879_v3 }
 0x8c5   :  { %5342 = vmatmul.mubr.f32.vlgmr.msra.gmra.mxu0 %v1753_v60  ;;  %5389 = vmatpush3.msra.mxu1 %v5928_v4 }
 0x8c6   :  { %5356 = vmatpush3.msra.mxu0 %v5943_v9  ;;  %5390 = vmatprep.subr.mxu1 %v5879_v3 }
 0x8c7   :  { %5357 = vmatprep.subr.mxu0 %v5879_v3  ;;  %5391 = vmatpush3.msra.mxu1 %v5930_v5 }
 0x8c8   :  { %5358 = vmatpush3.msra.mxu0 %v5946_v10  ;;  %5392 = vmatprep.subr.mxu1 %v5879_v3 }
 0x8c9   :  { %5359 = vmatprep.subr.mxu0 %v5879_v3  ;;  %5393 = vmatpush3.msra.mxu1 %v5932_v6 }
 0x8ca   :  { %5360 = vmatpush3.msra.mxu0 %v5949_v11  ;;  %5394 = vmatprep.subr.mxu1 %v5879_v3 }
 0x8cb   :  { %5361 = vmatprep.subr.mxu0 %v5879_v3  ;;  %5363 = vmatprep.mubr.msk.f32.mxu0 %vm5880_vm0, %v5879_v3 }
 0x8cc   :  { %5362 = vmatpush3.msra.mxu0 %v5953_v12  ;;  %5395 = vmatpush3.msra.mxu1 %v5935_v8 }
 0x8cd   :  { %5396 = vmatprep.mubr.msk.f32.mxu1 %vm5880_vm0, %v5879_v3  ;;  %5364 = vmatmul.mubr.f32.vlgmr.msra.gmra.mxu0 %v1750_v56 }
 0x8ce   :  { %5377 = vmatprep.subr.mxu0 %v5879_v3  ;;  %5397 = vmatmul.mubr.f32.vlgmr.msra.gmra.mxu1 %v1749_v55 }
 0x8cf   :  { %5378 = vmatpush3.msra.mxu0 %v5957_v13  ;;  %5385 = vmatprep.mubr.msk.f32.mxu0 %vm5880_vm0, %v5879_v3 }
 0x8d0   :  { %5379 = vmatprep.subr.mxu0 %v5879_v3  ;;  %5410 = vmatprep.subr.mxu1 %v5879_v3 }
 0x8d1   :  { %5380 = vmatpush3.msra.mxu0 %v5960_v14  ;;  %5411 = vmatpush3.msra.mxu1 %v5978_v20 }
 0x8d2   :  { %5381 = vmatprep.subr.mxu0 %v5879_v3  ;;  %5412 = vmatprep.subr.mxu1 %v5879_v3 }
 0x8d3   :  { %5382 = vmatpush3.msra.mxu0 %v5963_v15  ;;  %5413 = vmatpush3.msra.mxu1 %v5980_v21 }
 0x8d4   :  { %5383 = vmatprep.subr.mxu0 %v5879_v3  ;;  %5414 = vmatprep.subr.mxu1 %v5879_v3 }
 0x8d5   :  { %5384 = vmatpush3.msra.mxu0 %v5967_v16  ;;  %5415 = vmatpush3.msra.mxu1 %v5988_v23 }
 0x8d6   :  { %5386 = vmatmul.mubr.f32.vlgmr.msra.gmra.mxu0 %v1749_v55  ;;  %5416 = vmatprep.subr.mxu1 %v5879_v3 }
 0x8d7   :  { %5417 = vmatpush3.msra.mxu1 %v5994_v24  ;;  %5399 = vmatprep.subr.mxu0 %v5879_v3 }
 0x8d8   :  { %5418 = vmatprep.mubr.msk.f32.mxu1 %vm5880_vm0, %v5879_v3  ;;  %5432 = vmatprep.subr.mxu1 %v5879_v3 }
 0x8d9   :  { %5400 = vmatpush3.msra.mxu0 %v5928_v4  ;;  %5407 = vmatprep.mubr.msk.f32.mxu0 %vm5880_vm0, %v5879_v3 }
 0x8da   :  { %5401 = vmatprep.subr.mxu0 %v5879_v3 }
 0x8db   :  { %5402 = vmatpush3.msra.mxu0 %v5930_v5 }
 0x8dc   :  { %5403 = vmatprep.subr.mxu0 %v5879_v3 }
 0x8dd   :  { %5404 = vmatpush3.msra.mxu0 %v5932_v6 }
 0x8de   :  { %5405 = vmatprep.subr.mxu0 %v5879_v3 }
 0x8df   :  { %5406 = vmatpush3.msra.mxu0 %v5935_v8 }
 0x8e0   :  { %5421 = vmatprep.subr.mxu0 %v5879_v3 }
 0x97c   :  { %v1846_v57 = vpop.f32.mrf.mxu1 }
 0x97e   :  { %v5354_v59 = vpop.f32.mrf.mxu1 }
 0x984   :  { %v2003_v61 = vpop.f32.mrf.mxu1 }
 0x985   :  { %v1755_v62 = vpop.f32.mrf.mxu0 }
 0x986   :  { %v5376_v63 = vpop.f32.mrf.mxu1  ;;  %v1847_v7 = vadd.f32 %v1846_v57, %v1755_v62 }
 0x987   :  { %v5343_v0 = vpop.f32.mrf.mxu0 }
 0x98d   :  { %v1926_v1 = vpop.f32.mrf.mxu0 }
 0x98e   :  { %v2161_v2 = vpop.f32.mrf.mxu1  ;;  %v1927_v19 = vadd.f32 %v1926_v1, %v1847_v7 }
 0x98f   :  { %v5365_v17 = vpop.f32.mrf.mxu0 }
 0x990   :  { %v5398_v18 = vpop.f32.mrf.mxu1  ;;  %v2004_v22 = vadd.f32 %v2003_v61, %v1927_v19 }
 0x991   :  { %v107_v18 = vld [vmem:[%s106_s20] sm:$0x1] }
 0x996   :  { %v2086_v25 = vpop.f32.mrf.mxu0 }
 0x997   :  { %v2087_v26 = vadd.f32 %v2086_v25, %v2004_v22 }
 0x998   :  { %v5387_v28 = vpop.f32.mrf.mxu0 }
 0x999   :  { %v2162_v29 = vadd.f32 %v2161_v2, %v2087_v26 }
 0x99b   :  { %v2165_v30 = vadd.f32 %v2162_v29, %v100_v27 }
 0x99d   :  { %v2166_v31 = vmul.f32 %v2165_v30, %v6063_v45 }
 0x99f   :  { %5753 = vtanh.f32 %v2166_v31 }
 0x9ac   :  { %v5754_v32 = vpop.eup %5753 }
 0x9ad   :  { %v2168_v33 = vmul.f32 %v5754_v32, %v6063_v45 }
 0x9af   :  { %v2169_v34 = vadd.f32 %v2168_v33, %v6066_v50 }
 0x9b1   :  { %2172 = vrot.lane.b32.xlu0 %v2169_v34, %s5882_s11  ;;  %v2170_v37 = vmul.f32 %v2169_v34, %v6222_v42 }
 0xa23   :  { %v2173_v35 = vpop.permute.xlu0 %2172 }
 0xa24   :  { %v2175_v36 = vmul.f32 %v2173_v35, %v2169_v34 }
 0xa26   :  { %2177 = vrot.lane.b32.xlu1 %v2175_v36, %s5883_s12 }
 0xa98   :  { %v2178_v38 = vpop.permute.xlu1 %2177 }
 0xa99   :  { %v6298_v39 = vadd.f32 %v2178_v38, %v2170_v37 }
 0xa9b   :  { %5755 = vtanh.f32 %v6298_v39 }
 0xaa8   :  { %v5756_v40 = vpop.eup %5755 }
 0xaa9   :  { %2183 = vrot.lane.b32.xlu0 %v5756_v40, %s5882_s11 }
 0xb1b   :  { %v2184_v41 = vpop.permute.xlu0 %2183 }
 0xb1c   :  { %v2186_v43 = vmul.f32 %v2184_v41, %v2169_v34 }
 0xb1e   :  { %v4239_v44 = vrot.slane %v2186_v43, 5  ;;  %2188 = vrot.lane.b32.xlu1 %v2186_v43, %s5883_s12 }
 0xb20   :  { %v6304_v46 = vsel %vm4254_vm7, %v6229_v49, %v4239_v44 }
 0xb90   :  { %v2189_v47 = vpop.permute.xlu1 %2188 }
 0xb91   :  { %v2190_v42 = vsel %vm140_vm4, %v2189_v47, 0 }
 0xb92   :  { %v2261_v48 = vand.u32 4294901760, %v2190_v42 }
 0xb94   :  { %v2262_v51 = vsub.f32 %v2190_v42, %v2261_v48  ;;  %5419 = vmatmul.mubr.f32.vlgmr.msra.gmra.mxu1 %v2261_v48 }
 0xb95   :  { %5433 = vmatpush3.msra.mxu1 %v5928_v4  ;;  %5440 = vmatprep.mubr.msk.f32.mxu1 %vm5880_vm0, %v5879_v3 }
 0xb96   :  { %v2263_v52 = vand.u32 4294901760, %v2262_v51  ;;  %5434 = vmatprep.subr.mxu1 %v5879_v3 }
 0xb97   :  { %5435 = vmatpush3.msra.mxu1 %v5930_v5 }
 0xb98   :  { %v2264_v54 = vsub.f32 %v2262_v51, %v2263_v52  ;;  %5436 = vmatprep.subr.mxu1 %v5879_v3 }
 0xb99   :  { %5437 = vmatpush3.msra.mxu1 %v5932_v6 }
 0xb9a   :  { %v2265_v49 = vand.u32 4294901760, %v2264_v54  ;;  %5438 = vmatprep.subr.mxu1 %v5879_v3 }
 0xb9b   :  { %5439 = vmatpush3.msra.mxu1 %v5935_v8 }
 0xb9c   :  { %5441 = vmatmul.mubr.f32.vlgmr.msra.gmra.mxu1 %v2263_v52  ;;  %5454 = vmatprep.subr.mxu1 %v5879_v3 }
 0xb9d   :  { %5408 = vmatmul.mubr.f32.vlgmr.msra.gmra.mxu0 %v2265_v49  ;;  %5455 = vmatpush3.msra.mxu1 %v5928_v4 }
 0xb9e   :  { %5422 = vmatpush3.msra.mxu0 %v5943_v9  ;;  %5456 = vmatprep.subr.mxu1 %v5879_v3 }
 0xb9f   :  { %5423 = vmatprep.subr.mxu0 %v5879_v3  ;;  %5457 = vmatpush3.msra.mxu1 %v5930_v5 }
 0xba0   :  { %5424 = vmatpush3.msra.mxu0 %v5946_v10  ;;  %5458 = vmatprep.subr.mxu1 %v5879_v3 }
 0xba1   :  { %5425 = vmatprep.subr.mxu0 %v5879_v3  ;;  %5459 = vmatpush3.msra.mxu1 %v5932_v6 }
 0xba2   :  { %5426 = vmatpush3.msra.mxu0 %v5949_v11  ;;  %5460 = vmatprep.subr.mxu1 %v5879_v3 }
 0xba3   :  { %5427 = vmatprep.subr.mxu0 %v5879_v3  ;;  %5429 = vmatprep.mubr.msk.f32.mxu0 %vm5880_vm0, %v5879_v3 }
 0xba4   :  { %5428 = vmatpush3.msra.mxu0 %v5953_v12  ;;  %5461 = vmatpush3.msra.mxu1 %v5935_v8 }
 0xba5   :  { %5462 = vmatprep.mubr.msk.f32.mxu1 %vm5880_vm0, %v5879_v3  ;;  %5430 = vmatmul.mubr.f32.vlgmr.msra.gmra.mxu0 %v2262_v51 }
 0xba6   :  { %5443 = vmatprep.subr.mxu0 %v5879_v3  ;;  %5463 = vmatmul.mubr.f32.vlgmr.msra.gmra.mxu1 %v2261_v48 }
 0xba7   :  { %5444 = vmatpush3.msra.mxu0 %v5957_v13  ;;  %5451 = vmatprep.mubr.msk.f32.mxu0 %vm5880_vm0, %v5879_v3 }
 0xba8   :  { %5445 = vmatprep.subr.mxu0 %v5879_v3  ;;  %5476 = vmatprep.subr.mxu1 %v5879_v3 }
 0xba9   :  { %5446 = vmatpush3.msra.mxu0 %v5960_v14  ;;  %5477 = vmatpush3.msra.mxu1 %v5978_v20 }
 0xbaa   :  { %5447 = vmatprep.subr.mxu0 %v5879_v3  ;;  %5478 = vmatprep.subr.mxu1 %v5879_v3 }
 0xbab   :  { %5448 = vmatpush3.msra.mxu0 %v5963_v15  ;;  %5479 = vmatpush3.msra.mxu1 %v5980_v21 }
 0xbac   :  { %5449 = vmatprep.subr.mxu0 %v5879_v3  ;;  %5480 = vmatprep.subr.mxu1 %v5879_v3 }
 0xbad   :  { %5450 = vmatpush3.msra.mxu0 %v5967_v16  ;;  %5481 = vmatpush3.msra.mxu1 %v5988_v23 }
 0xbae   :  { %5452 = vmatmul.mubr.f32.vlgmr.msra.gmra.mxu0 %v2261_v48  ;;  %5482 = vmatprep.subr.mxu1 %v5879_v3 }
 0xbaf   :  { %5483 = vmatpush3.msra.mxu1 %v5994_v24  ;;  %5465 = vmatprep.subr.mxu0 %v5879_v3 }
 0xbb0   :  { %5484 = vmatprep.mubr.msk.f32.mxu1 %vm5880_vm0, %v5879_v3  ;;  %5498 = vmatprep.subr.mxu1 %v5879_v3 }
 0xbb1   :  { %5466 = vmatpush3.msra.mxu0 %v5928_v4  ;;  %5473 = vmatprep.mubr.msk.f32.mxu0 %vm5880_vm0, %v5879_v3 }
 0xbb2   :  { %5467 = vmatprep.subr.mxu0 %v5879_v3 }
 0xbb3   :  { %5468 = vmatpush3.msra.mxu0 %v5930_v5 }
 0xbb4   :  { %5469 = vmatprep.subr.mxu0 %v5879_v3 }
 0xbb5   :  { %5470 = vmatpush3.msra.mxu0 %v5932_v6 }
 0xbb6   :  { %5471 = vmatprep.subr.mxu0 %v5879_v3 }
 0xbb7   :  { %5472 = vmatpush3.msra.mxu0 %v5935_v8 }
 0xbb8   :  { %5487 = vmatprep.subr.mxu0 %v5879_v3 }
 0xc54   :  { %v2358_v55 = vpop.f32.mrf.mxu1 }
 0xc56   :  { %v5420_v56 = vpop.f32.mrf.mxu1 }
 0xc5c   :  { %v2515_v53 = vpop.f32.mrf.mxu1 }
 0xc5d   :  { %v2267_v58 = vpop.f32.mrf.mxu0 }
 0xc5e   :  { %v5442_v60 = vpop.f32.mrf.mxu1  ;;  %v2359_v62 = vadd.f32 %v2358_v55, %v2267_v58 }
 0xc5f   :  { %v5409_v57 = vpop.f32.mrf.mxu0 }
 0xc65   :  { %v2438_v59 = vpop.f32.mrf.mxu0 }
 0xc66   :  { %v2673_v61 = vpop.f32.mrf.mxu1  ;;  %v2439_v1 = vadd.f32 %v2438_v59, %v2359_v62 }
 0xc67   :  { %v5431_v63 = vpop.f32.mrf.mxu0 }
 0xc68   :  { %v5464_v0 = vpop.f32.mrf.mxu1  ;;  %v2516_v2 = vadd.f32 %v2515_v53, %v2439_v1 }
 0xc69   :  { %v114_v0 = vld [vmem:[%s113_s22] sm:$0x1] }
 0xc6e   :  { %v2598_v7 = vpop.f32.mrf.mxu0 }
 0xc6f   :  { %v2599_v17 = vadd.f32 %v2598_v7, %v2516_v2 }
 0xc70   :  { %v5453_v19 = vpop.f32.mrf.mxu0 }
 0xc71   :  { %v2674_v22 = vadd.f32 %v2673_v61, %v2599_v17 }
 0xc73   :  { %v2677_v25 = vadd.f32 %v2674_v22, %v107_v18 }
 0xc75   :  { %v2678_v26 = vmul.f32 %v2677_v25, %v6063_v45 }
 0xc77   :  { %5757 = vtanh.f32 %v2678_v26 }
 0xc84   :  { %v5758_v27 = vpop.eup %5757 }
 0xc85   :  { %v2680_v28 = vmul.f32 %v5758_v27, %v6063_v45 }
 0xc87   :  { %v2681_v29 = vadd.f32 %v2680_v28, %v6066_v50 }
 0xc89   :  { %2684 = vrot.lane.b32.xlu0 %v2681_v29, %s5882_s11  ;;  %v2682_v32 = vmul.f32 %v2681_v29, %v6298_v39 }
 0xcfb   :  { %v2685_v30 = vpop.permute.xlu0 %2684 }
 0xcfc   :  { %v2687_v31 = vmul.f32 %v2685_v30, %v2681_v29 }
 0xcfe   :  { %2689 = vrot.lane.b32.xlu1 %v2687_v31, %s5883_s12 }
 0xd70   :  { %v2690_v33 = vpop.permute.xlu1 %2689 }
 0xd71   :  { %v6373_v34 = vadd.f32 %v2690_v33, %v2682_v32 }
 0xd73   :  { %5759 = vtanh.f32 %v6373_v34 }
 0xd80   :  { %v5760_v35 = vpop.eup %5759 }
 0xd81   :  { %2695 = vrot.lane.b32.xlu0 %v5760_v35, %s5882_s11 }
 0xdf3   :  { %v2696_v36 = vpop.permute.xlu0 %2695 }
 0xdf4   :  { %v2698_v37 = vmul.f32 %v2696_v36, %v2681_v29 }
 0xdf6   :  { %v4241_v38 = vrot.slane %v2698_v37, 4  ;;  %2700 = vrot.lane.b32.xlu1 %v2698_v37, %s5883_s12 }
 0xdf8   :  { %v6379_v40 = vsel %vm4256_vm8, %v6304_v46, %v4241_v38 }
 0xe68   :  { %v2701_v41 = vpop.permute.xlu1 %2700 }
 0xe69   :  { %v2702_v39 = vsel %vm140_vm4, %v2701_v41, 0 }
 0xe6a   :  { %v2773_v43 = vand.u32 4294901760, %v2702_v39 }
 0xe6c   :  { %v2774_v44 = vsub.f32 %v2702_v39, %v2773_v43  ;;  %5485 = vmatmul.mubr.f32.vlgmr.msra.gmra.mxu1 %v2773_v43 }
 0xe6d   :  { %5499 = vmatpush3.msra.mxu1 %v5928_v4  ;;  %5506 = vmatprep.mubr.msk.f32.mxu1 %vm5880_vm0, %v5879_v3 }
 0xe6e   :  { %v2775_v47 = vand.u32 4294901760, %v2774_v44  ;;  %5500 = vmatprep.subr.mxu1 %v5879_v3 }
 0xe6f   :  { %5501 = vmatpush3.msra.mxu1 %v5930_v5 }
 0xe70   :  { %v2776_v42 = vsub.f32 %v2774_v44, %v2775_v47  ;;  %5502 = vmatprep.subr.mxu1 %v5879_v3 }
 0xe71   :  { %5503 = vmatpush3.msra.mxu1 %v5932_v6 }
 0xe72   :  { %v2777_v46 = vand.u32 4294901760, %v2776_v42  ;;  %5504 = vmatprep.subr.mxu1 %v5879_v3 }
 0xe73   :  { %5505 = vmatpush3.msra.mxu1 %v5935_v8 }
 0xe74   :  { %5507 = vmatmul.mubr.f32.vlgmr.msra.gmra.mxu1 %v2775_v47  ;;  %5520 = vmatprep.subr.mxu1 %v5879_v3 }
 0xe75   :  { %5474 = vmatmul.mubr.f32.vlgmr.msra.gmra.mxu0 %v2777_v46  ;;  %5521 = vmatpush3.msra.mxu1 %v5928_v4 }
 0xe76   :  { %5488 = vmatpush3.msra.mxu0 %v5943_v9  ;;  %5522 = vmatprep.subr.mxu1 %v5879_v3 }
 0xe77   :  { %5489 = vmatprep.subr.mxu0 %v5879_v3  ;;  %5523 = vmatpush3.msra.mxu1 %v5930_v5 }
 0xe78   :  { %5490 = vmatpush3.msra.mxu0 %v5946_v10  ;;  %5524 = vmatprep.subr.mxu1 %v5879_v3 }
 0xe79   :  { %5491 = vmatprep.subr.mxu0 %v5879_v3  ;;  %5525 = vmatpush3.msra.mxu1 %v5932_v6 }
 0xe7a   :  { %5492 = vmatpush3.msra.mxu0 %v5949_v11  ;;  %5526 = vmatprep.subr.mxu1 %v5879_v3 }
 0xe7b   :  { %5493 = vmatprep.subr.mxu0 %v5879_v3  ;;  %5495 = vmatprep.mubr.msk.f32.mxu0 %vm5880_vm0, %v5879_v3 }
 0xe7c   :  { %5494 = vmatpush3.msra.mxu0 %v5953_v12  ;;  %5527 = vmatpush3.msra.mxu1 %v5935_v8 }
 0xe7d   :  { %5528 = vmatprep.mubr.msk.f32.mxu1 %vm5880_vm0, %v5879_v3  ;;  %5496 = vmatmul.mubr.f32.vlgmr.msra.gmra.mxu0 %v2774_v44 }
 0xe7e   :  { %5509 = vmatprep.subr.mxu0 %v5879_v3  ;;  %5529 = vmatmul.mubr.f32.vlgmr.msra.gmra.mxu1 %v2773_v43 }
 0xe7f   :  { %5510 = vmatpush3.msra.mxu0 %v5957_v13  ;;  %5517 = vmatprep.mubr.msk.f32.mxu0 %vm5880_vm0, %v5879_v3 }
 0xe80   :  { %5511 = vmatprep.subr.mxu0 %v5879_v3  ;;  %5542 = vmatprep.subr.mxu1 %v5879_v3 }
 0xe81   :  { %5512 = vmatpush3.msra.mxu0 %v5960_v14  ;;  %5543 = vmatpush3.msra.mxu1 %v5978_v20 }
 0xe82   :  { %5513 = vmatprep.subr.mxu0 %v5879_v3  ;;  %5544 = vmatprep.subr.mxu1 %v5879_v3 }
 0xe83   :  { %5514 = vmatpush3.msra.mxu0 %v5963_v15  ;;  %5545 = vmatpush3.msra.mxu1 %v5980_v21 }
 0xe84   :  { %5515 = vmatprep.subr.mxu0 %v5879_v3  ;;  %5546 = vmatprep.subr.mxu1 %v5879_v3 }
 0xe85   :  { %5516 = vmatpush3.msra.mxu0 %v5967_v16  ;;  %5547 = vmatpush3.msra.mxu1 %v5988_v23 }
 0xe86   :  { %5518 = vmatmul.mubr.f32.vlgmr.msra.gmra.mxu0 %v2773_v43  ;;  %5548 = vmatprep.subr.mxu1 %v5879_v3 }
 0xe87   :  { %5549 = vmatpush3.msra.mxu1 %v5994_v24  ;;  %5531 = vmatprep.subr.mxu0 %v5879_v3 }
 0xe88   :  { %5550 = vmatprep.mubr.msk.f32.mxu1 %vm5880_vm0, %v5879_v3  ;;  %5564 = vmatprep.subr.mxu1 %v5879_v3 }
 0xe89   :  { %5532 = vmatpush3.msra.mxu0 %v5928_v4  ;;  %5539 = vmatprep.mubr.msk.f32.mxu0 %vm5880_vm0, %v5879_v3 }
 0xe8a   :  { %5533 = vmatprep.subr.mxu0 %v5879_v3 }
 0xe8b   :  { %5534 = vmatpush3.msra.mxu0 %v5930_v5 }
 0xe8c   :  { %5535 = vmatprep.subr.mxu0 %v5879_v3 }
 0xe8d   :  { %5536 = vmatpush3.msra.mxu0 %v5932_v6 }
 0xe8e   :  { %5537 = vmatprep.subr.mxu0 %v5879_v3 }
 0xe8f   :  { %5538 = vmatpush3.msra.mxu0 %v5935_v8 }
 0xe90   :  { %5553 = vmatprep.subr.mxu0 %v5879_v3 }
 0xf2c   :  { %v2870_v48 = vpop.f32.mrf.mxu1 }
 0xf2e   :  { %v5486_v51 = vpop.f32.mrf.mxu1 }
 0xf34   :  { %v3027_v52 = vpop.f32.mrf.mxu1 }
 0xf35   :  { %v2779_v54 = vpop.f32.mrf.mxu0 }
 0xf36   :  { %v5508_v49 = vpop.f32.mrf.mxu1  ;;  %v2871_v58 = vadd.f32 %v2870_v48, %v2779_v54 }
 0xf37   :  { %v5475_v55 = vpop.f32.mrf.mxu0 }
 0xf3d   :  { %v2950_v56 = vpop.f32.mrf.mxu0 }
 0xf3e   :  { %v3185_v53 = vpop.f32.mrf.mxu1  ;;  %v2951_v59 = vadd.f32 %v2950_v56, %v2871_v58  ;;  %v121_v56 = vld [vmem:[%s120_s24] sm:$0x1] }
 0xf3f   :  { %v5497_v60 = vpop.f32.mrf.mxu0 }
 0xf40   :  { %v5530_v57 = vpop.f32.mrf.mxu1  ;;  %v3028_v61 = vadd.f32 %v3027_v52, %v2951_v59 }
 0xf46   :  { %v3110_v62 = vpop.f32.mrf.mxu0 }
 0xf47   :  { %v3111_v63 = vadd.f32 %v3110_v62, %v3028_v61 }
 0xf48   :  { %v5519_v1 = vpop.f32.mrf.mxu0 }
 0xf49   :  { %v3186_v2 = vadd.f32 %v3185_v53, %v3111_v63 }
 0xf4b   :  { %v3189_v7 = vadd.f32 %v3186_v2, %v114_v0 }
 0xf4d   :  { %v3190_v17 = vmul.f32 %v3189_v7, %v6063_v45 }
 0xf4f   :  { %5761 = vtanh.f32 %v3190_v17 }
 0xf5c   :  { %v5762_v18 = vpop.eup %5761 }
 0xf5d   :  { %v3192_v19 = vmul.f32 %v5762_v18, %v6063_v45 }
 0xf5f   :  { %v3193_v22 = vadd.f32 %v3192_v19, %v6066_v50 }
 0xf61   :  { %3196 = vrot.lane.b32.xlu0 %v3193_v22, %s5882_s11  ;;  %v3194_v27 = vmul.f32 %v3193_v22, %v6373_v34 }
 0xfd3   :  { %v3197_v25 = vpop.permute.xlu0 %3196 }
 0xfd4   :  { %v3199_v26 = vmul.f32 %v3197_v25, %v3193_v22 }
 0xfd6   :  { %3201 = vrot.lane.b32.xlu1 %v3199_v26, %s5883_s12 }
0x1048   :  { %v3202_v28 = vpop.permute.xlu1 %3201 }
0x1049   :  { %v6448_v29 = vadd.f32 %v3202_v28, %v3194_v27 }
0x104b   :  { %5763 = vtanh.f32 %v6448_v29 }
0x1058   :  { %v5764_v30 = vpop.eup %5763 }
0x1059   :  { %3207 = vrot.lane.b32.xlu0 %v5764_v30, %s5882_s11 }
0x10cb   :  { %v3208_v31 = vpop.permute.xlu0 %3207 }
0x10cc   :  { %v3210_v32 = vmul.f32 %v3208_v31, %v3193_v22 }
0x10ce   :  { %v4243_v33 = vrot.slane %v3210_v32, 3  ;;  %3212 = vrot.lane.b32.xlu1 %v3210_v32, %s5883_s12 }
0x10d0   :  { %v6454_v35 = vsel %vm4258_vm9, %v6379_v40, %v4243_v33 }
0x1140   :  { %v3213_v36 = vpop.permute.xlu1 %3212 }
0x1141   :  { %v3214_v34 = vsel %vm140_vm4, %v3213_v36, 0 }
0x1142   :  { %v3285_v37 = vand.u32 4294901760, %v3214_v34 }
0x1144   :  { %v3286_v38 = vsub.f32 %v3214_v34, %v3285_v37  ;;  %5551 = vmatmul.mubr.f32.vlgmr.msra.gmra.mxu1 %v3285_v37  ;;  %v128_v34 = vld [vmem:[%s127_s26] sm:$0x1] }
0x1145   :  { %5565 = vmatpush3.msra.mxu1 %v5928_v4  ;;  %5572 = vmatprep.mubr.msk.f32.mxu1 %vm5880_vm0, %v5879_v3 }
0x1146   :  { %v3287_v41 = vand.u32 4294901760, %v3286_v38  ;;  %5566 = vmatprep.subr.mxu1 %v5879_v3 }
0x1147   :  { %5567 = vmatpush3.msra.mxu1 %v5930_v5 }
0x1148   :  { %v3288_v39 = vsub.f32 %v3286_v38, %v3287_v41  ;;  %5568 = vmatprep.subr.mxu1 %v5879_v3 }
0x1149   :  { %5569 = vmatpush3.msra.mxu1 %v5932_v6 }
0x114a   :  { %v3289_v40 = vand.u32 4294901760, %v3288_v39  ;;  %5570 = vmatprep.subr.mxu1 %v5879_v3 }
0x114b   :  { %5571 = vmatpush3.msra.mxu1 %v5935_v8 }
0x114c   :  { %5573 = vmatmul.mubr.f32.vlgmr.msra.gmra.mxu1 %v3287_v41  ;;  %5586 = vmatprep.subr.mxu1 %v5879_v3 }
0x114d   :  { %5540 = vmatmul.mubr.f32.vlgmr.msra.gmra.mxu0 %v3289_v40  ;;  %5587 = vmatpush3.msra.mxu1 %v5928_v4 }
0x114e   :  { %5554 = vmatpush3.msra.mxu0 %v5943_v9  ;;  %5588 = vmatprep.subr.mxu1 %v5879_v3 }
0x114f   :  { %5555 = vmatprep.subr.mxu0 %v5879_v3  ;;  %5589 = vmatpush3.msra.mxu1 %v5930_v5 }
0x1150   :  { %5556 = vmatpush3.msra.mxu0 %v5946_v10  ;;  %5590 = vmatprep.subr.mxu1 %v5879_v3 }
0x1151   :  { %5557 = vmatprep.subr.mxu0 %v5879_v3  ;;  %5591 = vmatpush3.msra.mxu1 %v5932_v6 }
0x1152   :  { %5558 = vmatpush3.msra.mxu0 %v5949_v11  ;;  %5592 = vmatprep.subr.mxu1 %v5879_v3 }
0x1153   :  { %5559 = vmatprep.subr.mxu0 %v5879_v3  ;;  %5561 = vmatprep.mubr.msk.f32.mxu0 %vm5880_vm0, %v5879_v3 }
0x1154   :  { %5560 = vmatpush3.msra.mxu0 %v5953_v12  ;;  %5593 = vmatpush3.msra.mxu1 %v5935_v8 }
0x1155   :  { %5594 = vmatprep.mubr.msk.f32.mxu1 %vm5880_vm0, %v5879_v3  ;;  %5562 = vmatmul.mubr.f32.vlgmr.msra.gmra.mxu0 %v3286_v38 }
0x1156   :  { %5575 = vmatprep.subr.mxu0 %v5879_v3  ;;  %5595 = vmatmul.mubr.f32.vlgmr.msra.gmra.mxu1 %v3285_v37 }
0x1157   :  { %5576 = vmatpush3.msra.mxu0 %v5957_v13  ;;  %5583 = vmatprep.mubr.msk.f32.mxu0 %vm5880_vm0, %v5879_v3 }
0x1158   :  { %5577 = vmatprep.subr.mxu0 %v5879_v3  ;;  %5608 = vmatprep.subr.mxu1 %v5879_v3 }
0x1159   :  { %5578 = vmatpush3.msra.mxu0 %v5960_v14  ;;  %5609 = vmatpush3.msra.mxu1 %v5978_v20 }
0x115a   :  { %5579 = vmatprep.subr.mxu0 %v5879_v3  ;;  %5610 = vmatprep.subr.mxu1 %v5879_v3 }
0x115b   :  { %5580 = vmatpush3.msra.mxu0 %v5963_v15  ;;  %5611 = vmatpush3.msra.mxu1 %v5980_v21 }
0x115c   :  { %5581 = vmatprep.subr.mxu0 %v5879_v3  ;;  %5612 = vmatprep.subr.mxu1 %v5879_v3 }
0x115d   :  { %5582 = vmatpush3.msra.mxu0 %v5967_v16  ;;  %5613 = vmatpush3.msra.mxu1 %v5988_v23 }
0x115e   :  { %5584 = vmatmul.mubr.f32.vlgmr.msra.gmra.mxu0 %v3285_v37  ;;  %5614 = vmatprep.subr.mxu1 %v5879_v3 }
0x115f   :  { %5615 = vmatpush3.msra.mxu1 %v5994_v24  ;;  %5597 = vmatprep.subr.mxu0 %v5879_v3 }
0x1160   :  { %5616 = vmatprep.mubr.msk.f32.mxu1 %vm5880_vm0, %v5879_v3  ;;  %5630 = vmatprep.subr.mxu1 %v5879_v3 }
0x1161   :  { %5598 = vmatpush3.msra.mxu0 %v5928_v4  ;;  %5605 = vmatprep.mubr.msk.f32.mxu0 %vm5880_vm0, %v5879_v3 }
0x1162   :  { %5599 = vmatprep.subr.mxu0 %v5879_v3 }
0x1163   :  { %5600 = vmatpush3.msra.mxu0 %v5930_v5 }
0x1164   :  { %5601 = vmatprep.subr.mxu0 %v5879_v3 }
0x1165   :  { %5602 = vmatpush3.msra.mxu0 %v5932_v6 }
0x1166   :  { %5603 = vmatprep.subr.mxu0 %v5879_v3 }
0x1167   :  { %5604 = vmatpush3.msra.mxu0 %v5935_v8 }
0x1168   :  { %5619 = vmatprep.subr.mxu0 %v5879_v3 }
0x1204   :  { %v3382_v20 = vpop.f32.mrf.mxu1 }
0x1206   :  { %v5552_v21 = vpop.f32.mrf.mxu1 }
0x120c   :  { %v3539_v23 = vpop.f32.mrf.mxu1 }
0x120d   :  { %v3291_v24 = vpop.f32.mrf.mxu0 }
0x120e   :  { %v5574_v43 = vpop.f32.mrf.mxu1  ;;  %v3383_v46 = vadd.f32 %v3382_v20, %v3291_v24 }
0x120f   :  { %v5541_v44 = vpop.f32.mrf.mxu0 }
0x1215   :  { %v3462_v47 = vpop.f32.mrf.mxu0 }
0x1216   :  { %v3697_v42 = vpop.f32.mrf.mxu1  ;;  %v3463_v52 = vadd.f32 %v3462_v47, %v3383_v46  ;;  %v4266_v46 = vld [vmem:[#allocation9 + $0x10] sm:$0xff] }
0x1217   :  { %v5563_v48 = vpop.f32.mrf.mxu0 }
0x1218   :  { %v5596_v51 = vpop.f32.mrf.mxu1  ;;  %v3540_v54 = vadd.f32 %v3539_v23, %v3463_v52  ;;  %v4265_v48 = vld [vmem:[#allocation9 + $0x8] sm:$0xff]  ;;  %v6584_v52 = vand.u32 4294901760, %v4266_v46 }
0x121e   :  { %v3622_v49 = vpop.f32.mrf.mxu0 }
0x121f   :  { %v3623_v55 = vadd.f32 %v3622_v49, %v3540_v54  ;;  %v6592_v54 = vsub.f32 %v4266_v46, %v6584_v52 }
0x1220   :  { %v5585_v53 = vpop.f32.mrf.mxu0 }
0x1221   :  { %v3698_v58 = vadd.f32 %v3697_v42, %v3623_v55  ;;  %v4267_v42 = vld [vmem:[#allocation9 + $0x18] sm:$0xff] }
0x1222   :  { %v6582_v51 = vand.u32 4294901760, %v4267_v42 }
0x1223   :  { %v3701_v60 = vadd.f32 %v3698_v58, %v121_v56  ;;  %v4393_v56 = vand.u32 4294901760, %v6592_v54 }
0x1225   :  { %v3702_v57 = vmul.f32 %v3701_v60, %v6063_v45 }
0x1227   :  { %5765 = vtanh.f32 %v3702_v57  ;;  %v4394_v57 = vsub.f32 %v6592_v54, %v4393_v56 }
0x1234   :  { %v5766_v59 = vpop.eup %5765 }
0x1235   :  { %v3704_v61 = vmul.f32 %v5766_v59, %v6063_v45 }
0x1237   :  { %v3705_v62 = vadd.f32 %v3704_v61, %v6066_v50 }
0x1239   :  { %3708 = vrot.lane.b32.xlu0 %v3705_v62, %s5882_s11  ;;  %v3706_v1 = vmul.f32 %v3705_v62, %v6448_v29 }
0x12ab   :  { %v3709_v63 = vpop.permute.xlu0 %3708 }
0x12ac   :  { %v3711_v0 = vmul.f32 %v3709_v63, %v3705_v62 }
0x12ae   :  { %3713 = vrot.lane.b32.xlu1 %v3711_v0, %s5883_s12  ;;  %v4264_v0 = vld [vmem:[#allocation9] sm:$0xff] }
0x1320   :  { %v3714_v2 = vpop.permute.xlu1 %3713 }
0x1321   :  { %v6523_v7 = vadd.f32 %v3714_v2, %v3706_v1  ;;  %v4314_v1 = vand.u32 4294901760, %v4264_v0 }
0x1323   :  { %5767 = vtanh.f32 %v6523_v7  ;;  %v4406_v2 = vsub.f32 %v4264_v0, %v4314_v1 }
0x1330   :  { %v5768_v17 = vpop.eup %5767 }
0x1331   :  { %3719 = vrot.lane.b32.xlu0 %v5768_v17, %s5882_s11 }
0x13a3   :  { %v3720_v18 = vpop.permute.xlu0 %3719 }
0x13a4   :  { %v3722_v19 = vmul.f32 %v3720_v18, %v3705_v62  ;;  %v4395_v62 = vand.u32 4294901760, %v4394_v57 }
0x13a6   :  { %v4245_v22 = vrot.slane %v3722_v19, 2  ;;  %3724 = vrot.lane.b32.xlu1 %v3722_v19, %s5883_s12 }
0x13a8   :  { %v6529_v25 = vsel %vm4260_vm10, %v6454_v35, %v4245_v22 }
0x1418   :  { %v3725_v26 = vpop.permute.xlu1 %3724 }
0x1419   :  { %v3726_v27 = vsel %vm140_vm4, %v3725_v26, 0 }
0x141a   :  { %v3797_v28 = vand.u32 4294901760, %v3726_v27 }
0x141c   :  { %v3798_v29 = vsub.f32 %v3726_v27, %v3797_v28  ;;  %5617 = vmatmul.mubr.f32.vlgmr.msra.gmra.mxu1 %v3797_v28 }
0x141d   :  { %5631 = vmatpush3.msra.mxu1 %v5928_v4  ;;  %5638 = vmatprep.mubr.msk.f32.mxu1 %vm5880_vm0, %v5879_v3 }
0x141e   :  { %v3799_v30 = vand.u32 4294901760, %v3798_v29  ;;  %5632 = vmatprep.subr.mxu1 %v5879_v3 }
0x141f   :  { %5633 = vmatpush3.msra.mxu1 %v5930_v5 }
0x1420   :  { %v3800_v31 = vsub.f32 %v3798_v29, %v3799_v30  ;;  %5634 = vmatprep.subr.mxu1 %v5879_v3 }
0x1421   :  { %5635 = vmatpush3.msra.mxu1 %v5932_v6 }
0x1422   :  { %v3801_v32 = vand.u32 4294901760, %v3800_v31  ;;  %5636 = vmatprep.subr.mxu1 %v5879_v3 }
0x1423   :  { %5637 = vmatpush3.msra.mxu1 %v5935_v8 }
0x1424   :  { %5639 = vmatmul.mubr.f32.vlgmr.msra.gmra.mxu1 %v3799_v30  ;;  %5652 = vmatprep.subr.mxu1 %v5879_v3 }
0x1425   :  { %5606 = vmatmul.mubr.f32.vlgmr.msra.gmra.mxu0 %v3801_v32  ;;  %5653 = vmatpush3.msra.mxu1 %v5928_v4 }
0x1426   :  { %5620 = vmatpush3.msra.mxu0 %v5943_v9  ;;  %5654 = vmatprep.subr.mxu1 %v5879_v3 }
0x1427   :  { %5621 = vmatprep.subr.mxu0 %v5879_v3  ;;  %5655 = vmatpush3.msra.mxu1 %v5930_v5 }
0x1428   :  { %5622 = vmatpush3.msra.mxu0 %v5946_v10  ;;  %5656 = vmatprep.subr.mxu1 %v5879_v3 }
0x1429   :  { %5623 = vmatprep.subr.mxu0 %v5879_v3  ;;  %5657 = vmatpush3.msra.mxu1 %v5932_v6 }
0x142a   :  { %5624 = vmatpush3.msra.mxu0 %v5949_v11  ;;  %5658 = vmatprep.subr.mxu1 %v5879_v3 }
0x142b   :  { %5625 = vmatprep.subr.mxu0 %v5879_v3  ;;  %5627 = vmatprep.mubr.msk.f32.mxu0 %vm5880_vm0, %v5879_v3 }
0x142c   :  { %5626 = vmatpush3.msra.mxu0 %v5953_v12  ;;  %5659 = vmatpush3.msra.mxu1 %v5935_v8 }
0x142d   :  { %5660 = vmatprep.mubr.msk.f32.mxu1 %vm5880_vm0, %v5879_v3  ;;  %5628 = vmatmul.mubr.f32.vlgmr.msra.gmra.mxu0 %v3798_v29 }
0x142e   :  { %5641 = vmatprep.subr.mxu0 %v5879_v3  ;;  %5661 = vmatmul.mubr.f32.vlgmr.msra.gmra.mxu1 %v3797_v28 }
0x142f   :  { %5642 = vmatpush3.msra.mxu0 %v5957_v13  ;;  %5649 = vmatprep.mubr.msk.f32.mxu0 %vm5880_vm0, %v5879_v3 }
0x1430   :  { %5643 = vmatprep.subr.mxu0 %v5879_v3  ;;  %5674 = vmatprep.subr.mxu1 %v5879_v3 }
0x1431   :  { %5644 = vmatpush3.msra.mxu0 %v5960_v14  ;;  %5682 = vmatprep.mubr.msk.f32.mxu1 %vm5880_vm0, %v5879_v3 }
0x1432   :  { %5645 = vmatprep.subr.mxu0 %v5879_v3 }
0x1433   :  { %5646 = vmatpush3.msra.mxu0 %v5963_v15 }
0x1434   :  { %5647 = vmatprep.subr.mxu0 %v5879_v3 }
0x1435   :  { %5648 = vmatpush3.msra.mxu0 %v5967_v16 }
0x1436   :  { %5650 = vmatmul.mubr.f32.vlgmr.msra.gmra.mxu0 %v3797_v28  ;;  %5663 = vmatprep.subr.mxu0 %v5879_v3 }
0x1437   :  { %5671 = vmatprep.mubr.msk.f32.mxu0 %vm5880_vm0, %v5879_v3  ;;  %5664 = vmatpush3.msra.mxu0 %v6582_v51 }
0x1438   :  { %5665 = vmatprep.subr.mxu0 %v5879_v3 }
0x1439   :  { %5666 = vmatpush3.msra.mxu0 %v6584_v52 }
0x143a   :  { %5667 = vmatprep.subr.mxu0 %v5879_v3 }
0x14dc   :  { %v3894_v4 = vpop.f32.mrf.mxu1 }
0x14de   :  { %v5618_v5 = vpop.f32.mrf.mxu1 }
0x14e4   :  { %v4051_v6 = vpop.f32.mrf.mxu1 }
0x14e5   :  { %v3803_v8 = vpop.f32.mrf.mxu0 }
0x14e6   :  { %v5640_v9 = vpop.f32.mrf.mxu1  ;;  %v3895_v13 = vadd.f32 %v3894_v4, %v3803_v8 }
0x14e7   :  { %v5607_v10 = vpop.f32.mrf.mxu0 }
0x14ed   :  { %v3974_v11 = vpop.f32.mrf.mxu0 }
0x14ee   :  { %v4209_v12 = vpop.f32.mrf.mxu1  ;;  %v3975_v16 = vadd.f32 %v3974_v11, %v3895_v13 }
0x14ef   :  { %v5629_v14 = vpop.f32.mrf.mxu0 }
0x14f0   :  { %v5662_v15 = vpop.f32.mrf.mxu1  ;;  %v4052_v33 = vadd.f32 %v4051_v6, %v3975_v16 }
0x14f6   :  { %v4134_v35 = vpop.f32.mrf.mxu0 }
0x14f7   :  { %v4135_v36 = vadd.f32 %v4134_v35, %v4052_v33 }
0x14f8   :  { %v5651_v37 = vpop.f32.mrf.mxu0 }
0x14f9   :  { %v4210_v38 = vadd.f32 %v4209_v12, %v4135_v36  ;;  %v4848_v12 = vld [vmem:[%s6671_s4] ss:$0 sm:$0xff]  ;;  %s5884_s4 = smov [#allocation10]  }
0x14fa   :  { %s4782_s29 = sshll.u32 %s5884_s4, 4  ;;  %s4783_s29 = int_to_ptr.vmem [resolvable:$true] %s4782_s29 }
0x14fb   :  { %v4213_v41 = vadd.f32 %v4210_v38, %v128_v34  ;;  %s5845_s30 = scalar_lea.vmem %s4783_s29, 128  ;;  %p5850_p4 = scmp.lt.s32.totalorder %s4783_s29, %s4783_s29 }
0x14fc   :  { %p5846_p3 = scmp.ne.s32.totalorder %s4783_s29, %s5845_s30  ;;  %p5851_p5 = scmp.lt.s32.totalorder %s5845_s30, %s5845_s30 }
0x14fd   :  { %v4214_v39 = vmul.f32 %v4213_v41, %v6063_v45 }
0x14fe   :  { %p5852_p6 = por %p5851_p5, %p5850_p4 }
0x14ff   :  { %5769 = vtanh.f32 %v4214_v39 }
0x1500   :  { %p5853_p7 = pnand %p5852_p6, %p5846_p3 }
0x150c   :  { %v5770_v40 = vpop.eup %5769 }
0x150d   :  { %v4216_v20 = vmul.f32 %v5770_v40, %v6063_v45  ;;  %v6586_v45 = vand.u32 4294901760, %v4265_v48 }
0x150f   :  { %v4217_v21 = vadd.f32 %v4216_v20, %v6066_v50  ;;  %v6589_v50 = vsub.f32 %v4267_v42, %v6582_v51  ;;  %v6595_v49 = vsub.f32 %v4265_v48, %v6586_v45  ;;  %5668 = vmatpush3.msra.mxu0 %v6586_v45 }
0x1510   :  { %5669 = vmatprep.subr.mxu0 %v5879_v3 }
0x1511   :  { %4220 = vrot.lane.b32.xlu0 %v4217_v21, %s5882_s11  ;;  %v4218_v43 = vmul.f32 %v4217_v21, %v6523_v7  ;;  %v4386_v55 = vand.u32 4294901760, %v6589_v50  ;;  %v4400_v53 = vand.u32 4294901760, %v6595_v49  ;;  %5670 = vmatpush3.msra.mxu0 %v4314_v1  ;;  %v4407_v7 = vand.u32 4294901760, %v4406_v2 }
0x1512   :  { %5685 = vmatprep.subr.mxu0 %v5879_v3 }
0x1513   :  { %v4387_v60 = vsub.f32 %v6589_v50, %v4386_v55  ;;  %v4401_v59 = vsub.f32 %v6595_v49, %v4400_v53  ;;  %v4408_v17 = vsub.f32 %v4406_v2, %v4407_v7 }
0x1515   :  { %v4388_v61 = vand.u32 4294901760, %v4387_v60  ;;  %v4402_v63 = vand.u32 4294901760, %v4401_v59  ;;  %v4409_v18 = vand.u32 4294901760, %v4408_v17 }
0x1517   :  { %5675 = vmatpush3.msra.mxu1 %v4388_v61 }
0x1518   :  { %5676 = vmatprep.subr.mxu1 %v5879_v3 }
0x1519   :  { %5677 = vmatpush3.msra.mxu1 %v4395_v62 }
0x151a   :  { %5678 = vmatprep.subr.mxu1 %v5879_v3 }
0x151b   :  { %5679 = vmatpush3.msra.mxu1 %v4402_v63 }
0x151c   :  { %5680 = vmatprep.subr.mxu1 %v5879_v3 }
0x151d   :  { %5681 = vmatpush3.msra.mxu1 %v4409_v18 }
0x151e   :  { %5696 = vmatprep.subr.mxu1 %v5879_v3 }
0x1583   :  { %v4221_v23 = vpop.permute.xlu0 %4220 }
0x1584   :  { %v4223_v24 = vmul.f32 %v4221_v23, %v4217_v21 }
0x1586   :  { %4225 = vrot.lane.b32.xlu1 %v4223_v24, %s5883_s12 }
0x15f8   :  { %v4226_v44 = vpop.permute.xlu1 %4225 }
0x15f9   :  { %v4228_v47 = vadd.f32 %v4226_v44, %v4218_v43 }
0x15fb   :  { %5771 = vtanh.f32 %v4228_v47 }
0x1608   :  { %v5772_v58 = vpop.eup %5771 }
0x1609   :  { %4231 = vrot.lane.b32.xlu0 %v5772_v58, %s5882_s11 }
0x167b   :  { %v4232_v19 = vpop.permute.xlu0 %4231 }
0x167c   :  { %v4234_v22 = vmul.f32 %v4232_v19, %v4217_v21 }
0x167e   :  { %v4248_v26 = vrot.slane %v4234_v22, 1 }
0x1680   :  { %v4263_v27 = vsel %vm4262_vm11, %v6529_v25, %v4248_v26 }
0x1681   :  { %4276 = vrot.lane.b32.xlu1 %v4263_v27, %s5883_s12 }
0x16f3   :  { %v4277_v28 = vpop.permute.xlu1 %4276 }
0x16f4   :  { %v4278_v29 = vsel %vm140_vm4, %v4277_v28, 0 }
0x16f5   :  { %v4349_v30 = vand.u32 4294901760, %v4278_v29 }
0x16f7   :  { %v4350_v31 = vsub.f32 %v4278_v29, %v4349_v30  ;;  %5683 = vmatmul.mubr.f32.vlgmr.msra.gmra.mxu1 %v4349_v30 }
0x16f8   :  { %5697 = vmatpush3.msra.mxu1 %v6582_v51  ;;  %5704 = vmatprep.mubr.msk.f32.mxu1 %vm5880_vm0, %v5879_v3 }
0x16f9   :  { %v4351_v32 = vand.u32 4294901760, %v4350_v31  ;;  %5698 = vmatprep.subr.mxu1 %v5879_v3 }
0x16fa   :  { %5699 = vmatpush3.msra.mxu1 %v6584_v52 }
0x16fb   :  { %v4352_v4 = vsub.f32 %v4350_v31, %v4351_v32  ;;  %5700 = vmatprep.subr.mxu1 %v5879_v3 }
0x16fc   :  { %5701 = vmatpush3.msra.mxu1 %v6586_v45 }
0x16fd   :  { %v4353_v25 = vand.u32 4294901760, %v4352_v4  ;;  %5702 = vmatprep.subr.mxu1 %v5879_v3 }
0x16fe   :  { %5703 = vmatpush3.msra.mxu1 %v4314_v1 }
0x16ff   :  { %5705 = vmatmul.mubr.f32.vlgmr.msra.gmra.mxu1 %v4351_v32  ;;  %5718 = vmatprep.subr.mxu1 %v5879_v3 }
0x1700   :  { %5672 = vmatmul.mubr.f32.vlgmr.msra.gmra.mxu0 %v4353_v25  ;;  %5719 = vmatpush3.msra.mxu1 %v6582_v51 }
0x1701   :  { %5686 = vmatpush3.msra.mxu0 %v6589_v50  ;;  %5720 = vmatprep.subr.mxu1 %v5879_v3 }
0x1702   :  { %5687 = vmatprep.subr.mxu0 %v5879_v3  ;;  %5721 = vmatpush3.msra.mxu1 %v6584_v52 }
0x1703   :  { %5688 = vmatpush3.msra.mxu0 %v6592_v54  ;;  %5722 = vmatprep.subr.mxu1 %v5879_v3 }
0x1704   :  { %5689 = vmatprep.subr.mxu0 %v5879_v3  ;;  %5723 = vmatpush3.msra.mxu1 %v6586_v45 }
0x1705   :  { %5690 = vmatpush3.msra.mxu0 %v6595_v49  ;;  %5724 = vmatprep.subr.mxu1 %v5879_v3 }
0x1706   :  { %5691 = vmatprep.subr.mxu0 %v5879_v3  ;;  %5693 = vmatprep.mubr.msk.f32.mxu0 %vm5880_vm0, %v5879_v3 }
0x1707   :  { %5692 = vmatpush3.msra.mxu0 %v4406_v2  ;;  %5725 = vmatpush3.msra.mxu1 %v4314_v1 }
0x1708   :  { %5726 = vmatprep.mubr.msk.f32.mxu1 %vm5880_vm0, %v5879_v3  ;;  %5694 = vmatmul.mubr.f32.vlgmr.msra.gmra.mxu0 %v4350_v31 }
0x1709   :  { %5707 = vmatprep.subr.mxu0 %v5879_v3  ;;  %5727 = vmatmul.mubr.f32.vlgmr.msra.gmra.mxu1 %v4349_v30 }
0x170a   :  { %5708 = vmatpush3.msra.mxu0 %v4386_v55  ;;  %5715 = vmatprep.mubr.msk.f32.mxu0 %vm5880_vm0, %v5879_v3 }
0x170b   :  { %5709 = vmatprep.subr.mxu0 %v5879_v3 }
0x170c   :  { %5710 = vmatpush3.msra.mxu0 %v4393_v56 }
0x170d   :  { %5711 = vmatprep.subr.mxu0 %v5879_v3 }
0x170e   :  { %5712 = vmatpush3.msra.mxu0 %v4400_v53 }
0x170f   :  { %5713 = vmatprep.subr.mxu0 %v5879_v3 }
0x1710   :  { %5714 = vmatpush3.msra.mxu0 %v4407_v7 }
0x1711   :  { %5716 = vmatmul.mubr.f32.vlgmr.msra.gmra.mxu0 %v4349_v30 }
0x17b7   :  { %v4446_v5 = vpop.f32.mrf.mxu1 }
0x17b9   :  { %v5684_v6 = vpop.f32.mrf.mxu1 }
0x17bf   :  { %v4603_v8 = vpop.f32.mrf.mxu1 }
0x17c0   :  { %v4355_v9 = vpop.f32.mrf.mxu0 }
0x17c1   :  { %v5706_v10 = vpop.f32.mrf.mxu1  ;;  %v4356_v13 = vadd.f32 %v4848_v12, %v4355_v9 }
0x17c2   :  { %v5673_v11 = vpop.f32.mrf.mxu0 }
0x17c3   :  { %v4447_v16 = vadd.f32 %v4446_v5, %v4356_v13 }
0x17c8   :  { %v4526_v14 = vpop.f32.mrf.mxu0 }
0x17c9   :  { %v4761_v15 = vpop.f32.mrf.mxu1  ;;  %v4527_v36 = vadd.f32 %v4526_v14, %v4447_v16 }
0x17ca   :  { %v5695_v33 = vpop.f32.mrf.mxu0 }
0x17cb   :  { %v5728_v35 = vpop.f32.mrf.mxu1  ;;  %v4604_v3 = vadd.f32 %v4603_v8, %v4527_v36 }
0x17d1   :  { %v4686_v34 = vpop.f32.mrf.mxu0 }
0x17d2   :  { %v4687_v37 = vadd.f32 %v4686_v34, %v4604_v3 }
0x17d3   :  { %v5717_v38 = vpop.f32.mrf.mxu0 }
0x17d4   :  { %v4762_v41 = vadd.f32 %v4761_v15, %v4687_v37 }
0x17d6   :  { %4765 = vmax.xlane.f32.xlu0 %v4762_v41 }
0x185f   :  { %v4766_v39 = vpop.xlane.xlu0 %4765 }
0x1860   :  { %v4767_v40 = vsub.f32 %v4762_v41, %v4766_v39 }
0x1862   :  { %v4768_v20 = vmul.f32 1.442695, %v4767_v40 }
0x1864   :  { %5773 = vpow2.f32 %v4768_v20 }
0x1871   :  { %v5774_v21 = vpop.eup %5773 }
0x1872   :  { %4770 = vadd.xlane.f32.xlu1 %v5774_v21 }
0x18fb   :  { %v4771_v23 = vpop.xlane.xlu1 %4770 }
0x18fc   :  { %5775 = vlog2.f32 %v4771_v23 }
0x1909   :  { %v5776_v24 = vpop.eup %5775 }
0x190a   :  { %v4773_v43 = vmul.f32 0.6931472, %v5776_v24 }
0x190c   :  { %v4774_v44 = vsub.f32 %v4767_v40, %v4773_v43 }
0x190e   :  { %4775 = vst [vmem:[#allocation10] sm:$0xff] %v4774_v44 }
0x190f   :  { %5856 = shalt.err (!%p5853_p7)
}
0x1910   :  { %4785 = dma.vmem_to_hbm [thread:$0]  %s4783_s29, 128, %s6672_s5, [#allocation4]  }
0x1911   :  { %5871 = dma.done.wait [#allocation4], 128  }
0x1912   :  { %5872 = vsyncadd [#allocation4], 4294967168 }
0x1913   :  { %4789 = vsyncpa [#allocation3], 1 }
0x1914   :  { %4790 = vsyncpa [#allocation8], 1 }
0x1915   :  { %4791 = vsyncpa [#allocation4], 1 }
0x1916   :  { %4792 = vsyncpa [#allocation5], 1 }

</bundles_post_ra>
